<compile_context>
chip_gen: v7x
topology: tpu7x:2x2x1
jax: 0.10.0
libtpu: 0.0.40
codegen_flags: <defaults>
</compile_context>

<pallas_src>
import functools

import jax
import jax.numpy as jnp
from jax.experimental import pallas as pl
from jax.experimental.pallas import tpu as pltpu

NEG_SLOPE = 0.01  # nn.LeakyReLU() default negative_slope


def _round_up(x, m):
    return ((x + m - 1) // m) * m


def _leaky_relu(y):
    return jnp.where(y > 0, y, NEG_SLOPE * y)


def _mlp_fused_kernel(x_ref, w0_ref, wrest_ref, b_ref, o_ref, *, num_rest):
    """One batch tile through the whole MLP.

    x_ref:     [B_tile, 784]             f32   (unpadded input features)
    w0_ref:    [784, H_PAD]              bf16  (input layer, out-dim padded)
    wrest_ref: [num_rest, H_PAD, H_PAD]  bf16  (hidden + output layers, padded)
    b_ref:     [num_rest + 1, H_PAD]     f32   (all biases, packed + padded)
    o_ref:     [B_tile, H_PAD]           f32   (lane-dense padded logits)
    """
    b_all = b_ref[...]                                   # load biases once

    # Layer 0: 784 -> H(->128); cast x tile to bf16 for the MXU, accumulate f32.
    x_bf = x_ref[...].astype(jnp.bfloat16)
    y = jnp.dot(x_bf, w0_ref[...], preferred_element_type=jnp.float32)
    act = _leaky_relu(y + b_all[0])                      # f32 epilogue

    # Remaining layers (hidden + output), statically unrolled; activation is a
    # register value, never round-tripped through VMEM.
    for l in range(num_rest):
        y = jnp.dot(act.astype(jnp.bfloat16), wrest_ref[l],
                    preferred_element_type=jnp.float32)
        act = _leaky_relu(y + b_all[l + 1])

    o_ref[...] = act.astype(o_ref.dtype)


def mnist_mlp_fused(x, w0, wrest, b, *, b_tile):
    """x: [B_pad, 784] f32; returns lane-dense padded logits [B_pad, H_PAD] f32."""
    B_pad, din = x.shape
    h_pad = w0.shape[1]
    num_rest = wrest.shape[0]
    num_layers = num_rest + 1
    assert B_pad % b_tile == 0 and b_tile % 8 == 0

    flops = 2 * B_pad * (din * h_pad + num_rest * h_pad * h_pad)
    bytes_accessed = (B_pad * din * 4                  # x  (f32)
                      + din * h_pad * 2                # w0 (bf16)
                      + num_rest * h_pad * h_pad * 2   # wrest (bf16)
                      + num_layers * h_pad * 4         # biases (f32)
                      + B_pad * h_pad * 4)             # out (f32)

    kernel = functools.partial(_mlp_fused_kernel, num_rest=num_rest)
    return pl.pallas_call(
        kernel,
        out_shape=jax.ShapeDtypeStruct((B_pad, h_pad), jnp.float32),
        grid=(B_pad // b_tile,),
        in_specs=[
            # batch tile of activations — changes per grid step
            pl.BlockSpec((b_tile, din), lambda i: (i, 0)),
            # weights / biases: full-extent, constant index_map -> stay
            # VMEM-resident across batch tiles (no re-DMA per step)
            pl.BlockSpec((din, h_pad), lambda i: (0, 0)),
            pl.BlockSpec((num_rest, h_pad, h_pad), lambda i: (0, 0, 0)),
            pl.BlockSpec((num_layers, h_pad), lambda i: (0, 0)),
        ],
        out_specs=pl.BlockSpec((b_tile, h_pad), lambda i: (i, 0)),
        compiler_params=pltpu.CompilerParams(
            dimension_semantics=("parallel",)),
        cost_estimate=pl.CostEstimate(
            flops=int(flops), transcendentals=0,
            bytes_accessed=int(bytes_accessed)),
    )(x, w0, wrest, b)


def _pad_to(a, shape):
    pads = [(0, s - d) for d, s in zip(a.shape, shape)]
    return jnp.pad(a, pads)


def pack_params(params):
    """Pad/pack/cast the per-layer (w, b) list ONCE at init (outside jit).

    w0 keeps its 784 input rows; all output dims pad to a multiple of 128
    (lane-dense). Weights are stored bf16 (MXU-native on v5e/v6e/v7x);
    biases stay f32 for the f32 epilogue.
    """
    din = params[0][0].shape[0]
    h_pad = _round_up(max(max(w.shape[1] for (w, _) in params), 128), 128)

    w0 = _pad_to(params[0][0], (din, h_pad)).astype(jnp.bfloat16)
    wrest = jnp.stack([_pad_to(w, (h_pad, h_pad)) for (w, _) in params[1:]]
                      ).astype(jnp.bfloat16)
    b = jnp.stack([_pad_to(bb, (h_pad,)) for (_, bb) in params]
                  ).astype(jnp.float32)
    return w0, wrest, b


def _num_tensorcores():
    """Best-effort: v7x exposes 2 TensorCores per chip; v5e/v6e have 1."""
    try:
        kind = jax.devices()[0].device_kind.lower()
    except Exception:
        return 1
    return 2 if "v7" in kind else 1


def _choose_b_tile(batch, num_cores):
    """One grid step for small batches on single-TC chips (each grid step is a
    sequential-loop iteration costing ~0.35us); one tile per TensorCore on
    v7x; ~512-row tiles for large batches (amortizes step overhead, near HBM
    roofline, only ~2 MiB/tile VMEM)."""
    b8 = _round_up(batch, 8)
    per_core = _round_up(pl.cdiv(b8, max(num_cores, 1)), 8)
    return min(per_core, 512)


def mnist_model_forward(x, w0_pad, wrest_pad, b_pad, *, num_classes=10,
                        b_tile=None):
    """Forward identical to PyTorch MNISTModel.forward:
    x = LeakyReLU(layer(x)) for every layer, including the output layer.

    Takes the pre-packed (padded, bf16) parameters from pack_params.
    """
    B, _ = x.shape
    if b_tile is None:
        b_tile = _choose_b_tile(B, _num_tensorcores())
    B_pad = _round_up(B, b_tile)
    if B_pad != B:                       # batch-only padding (no feature pad)
        x = jnp.pad(x, ((0, B_pad - B), (0, 0)))

    out_pad = mnist_mlp_fused(x, w0_pad, wrest_pad, b_pad, b_tile=b_tile)
    # Padded weight columns / bias lanes are exact zeros and LeakyReLU(0) == 0,
    # so the first `num_classes` lanes are the exact logits. If the consumer
    # can take the lane-dense [B_pad, 128] slab directly, skip this slice.
    return out_pad[:B, :num_classes]


def init_mnist_params(key, num_hidden_layers, num_hidden_nodes):
    """Deterministic synthetic parameter init (stand-in for init_network_params).
    Weights stored [in, out] (transpose of nn.Linear's [out, in]); biases [out]."""
    layer_dims = [(784, num_hidden_nodes)]
    for _ in range(num_hidden_layers):
        layer_dims.append((num_hidden_nodes, num_hidden_nodes))
    layer_dims.append((num_hidden_nodes, 10))

    params = []
    for (din, dout) in layer_dims:
        key, wk, bk = jax.random.split(key, 3)
        scale = 1.0 / jnp.sqrt(jnp.float32(din))
        w = jax.random.uniform(wk, (din, dout), jnp.float32, -scale, scale)
        b = jax.random.uniform(bk, (dout,), jnp.float32, -scale, scale)
        params.append((w, b))
    return params


def mnist_model_reference(x, params, compute_dtype=jnp.float32):
    """Plain-JAX reference. compute_dtype=bfloat16 mirrors the kernel's
    bf16-matmul / f32-accumulate / f32-epilogue numerics."""
    for (w, b) in params:
        y = jnp.dot(x.astype(compute_dtype), w.astype(compute_dtype),
                    preferred_element_type=jnp.float32) + b
        x = jnp.where(y > 0, y, NEG_SLOPE * y)
    return x


if __name__ == "__main__":
    key = jax.random.PRNGKey(0)
    k_in, k_params = jax.random.split(key)

    num_hidden_layers = 2
    num_hidden_nodes = 32
    batch = 256  # 1 grid step on v5e/v6e, 2 parallel 128-row tiles on v7x

    # Input: flattened 28x28 MNIST images -> [batch, 784]
    x = jax.random.normal(k_in, (batch, 784), jnp.float32)
    params = init_mnist_params(k_params, num_hidden_layers, num_hidden_nodes)

    # Pad / pack / bf16-cast parameters ONCE, outside the jitted per-call path.
    w0_p, wrest_p, b_p = pack_params(params)

    fwd = jax.jit(mnist_model_forward)
    out = jax.block_until_ready(fwd(x, w0_p, wrest_p, b_p))
    assert out.shape == (batch, 10), out.shape

    # Tight check against a reference using the same bf16-matmul numerics.
    ref_bf16 = mnist_model_reference(x, params, compute_dtype=jnp.bfloat16)
    assert jnp.allclose(out, ref_bf16, atol=1e-4, rtol=1e-4), \
        "mismatch vs bf16-numerics reference"
    # Loose sanity check against the pure-f32 PyTorch-equivalent math.
    ref_f32 = mnist_model_reference(x, params, compute_dtype=jnp.float32)
    assert jnp.allclose(out, ref_f32, atol=1e-1, rtol=1e-1), \
        "mismatch vs f32 reference"

    print("KERNEL_OK")
</pallas_src>

<mosaic_0001>
module attributes {stable_mosaic.version = 11 : i64} {
  func.func @_mlp_fused_kernel(%arg0: i32, %arg1: memref<256x784xf32, #tpu.memory_space<vmem>>, %arg2: memref<784x128xbf16, #tpu.memory_space<vmem>>, %arg3: memref<3x128x128xbf16, #tpu.memory_space<vmem>>, %arg4: memref<4x128xf32, #tpu.memory_space<vmem>>, %arg5: memref<256x128xf32, #tpu.memory_space<vmem>>) attributes {dimension_semantics = [#tpu.dimension_semantics<parallel>], iteration_bounds = array<i64: 1>, scalar_prefetch = 0 : i64, scratch_operands = 0 : i64, tpu.core_type = #tpu.core_type<tc>, window_params = [{transform_indices = @transform_0, window_bounds = array<i64: 256, 784>}, {pipeline_mode = #tpu.pipeline_mode<synchronous>, transform_indices = @transform_1, window_bounds = array<i64: 784, 128>}, {pipeline_mode = #tpu.pipeline_mode<synchronous>, transform_indices = @transform_2, window_bounds = array<i64: 3, 128, 128>}, {pipeline_mode = #tpu.pipeline_mode<synchronous>, transform_indices = @transform_3, window_bounds = array<i64: 4, 128>}, {transform_indices = @transform_4, window_bounds = array<i64: 256, 128>}]} {
    %c0 = arith.constant 0 : index
    %c0_0 = arith.constant 0 : index
    %0 = vector.load %arg4[%c0, %c0_0] : memref<4x128xf32, #tpu.memory_space<vmem>>, vector<4x128xf32>
    %c0_1 = arith.constant 0 : index
    %c0_2 = arith.constant 0 : index
    %1 = vector.load %arg1[%c0_1, %c0_2] : memref<256x784xf32, #tpu.memory_space<vmem>>, vector<256x784xf32>
    %2 = arith.truncf %1 : vector<256x784xf32> to vector<256x784xbf16>
    %c0_3 = arith.constant 0 : index
    %c0_4 = arith.constant 0 : index
    %3 = vector.load %arg2[%c0_3, %c0_4] : memref<784x128xbf16, #tpu.memory_space<vmem>>, vector<784x128xbf16>
    %cst = arith.constant dense<0.000000e+00> : vector<256x128xf32>
    %4 = tpu.matmul %2, %3, %cst {dimension_numbers = #tpu.dot_dimension_numbers<[1], [0], [0], [1], [0, 0, 1, 1], [], []>} : vector<256x784xbf16>, vector<784x128xbf16>, vector<256x128xf32> -> vector<256x128xf32>
    %5 = vector.extract_strided_slice %0 {offsets = [0, 0], sizes = [1, 128], strides = [1, 1]} : vector<4x128xf32> to vector<1x128xf32>
    %6 = vector.shape_cast %5 : vector<1x128xf32> to vector<128xf32>
    %7 = vector.shape_cast %6 : vector<128xf32> to vector<1x128xf32>
    %8 = vector.broadcast %7 : vector<1x128xf32> to vector<256x128xf32>
    %9 = arith.addf %4, %8 : vector<256x128xf32>
    %cst_5 = arith.constant 0.000000e+00 : f32
    %10 = vector.broadcast %cst_5 : f32 to vector<256x128xf32>
    %11 = arith.cmpf ogt, %9, %10 : vector<256x128xf32>
    %cst_6 = arith.constant 0.00999999977 : f32
    %12 = vector.broadcast %cst_6 : f32 to vector<256x128xf32>
    %13 = arith.mulf %12, %9 : vector<256x128xf32>
    %14 = arith.select %11, %9, %13 : vector<256x128xi1>, vector<256x128xf32>
    %15 = arith.truncf %14 : vector<256x128xf32> to vector<256x128xbf16>
    %c0_7 = arith.constant 0 : index
    %c0_8 = arith.constant 0 : index
    %c0_9 = arith.constant 0 : index
    %16 = vector.load %arg3[%c0_7, %c0_8, %c0_9] : memref<3x128x128xbf16, #tpu.memory_space<vmem>>, vector<1x128x128xbf16>
    %17 = vector.shape_cast %16 : vector<1x128x128xbf16> to vector<128x128xbf16>
    %cst_10 = arith.constant dense<0.000000e+00> : vector<256x128xf32>
    %18 = tpu.matmul %15, %17, %cst_10 {dimension_numbers = #tpu.dot_dimension_numbers<[1], [0], [0], [1], [0, 0, 1, 1], [], []>} : vector<256x128xbf16>, vector<128x128xbf16>, vector<256x128xf32> -> vector<256x128xf32>
    %19 = vector.extract_strided_slice %0 {offsets = [1, 0], sizes = [1, 128], strides = [1, 1]} : vector<4x128xf32> to vector<1x128xf32>
    %20 = vector.shape_cast %19 : vector<1x128xf32> to vector<128xf32>
    %21 = vector.shape_cast %20 : vector<128xf32> to vector<1x128xf32>
    %22 = vector.broadcast %21 : vector<1x128xf32> to vector<256x128xf32>
    %23 = arith.addf %18, %22 : vector<256x128xf32>
    %cst_11 = arith.constant 0.000000e+00 : f32
    %24 = vector.broadcast %cst_11 : f32 to vector<256x128xf32>
    %25 = arith.cmpf ogt, %23, %24 : vector<256x128xf32>
    %cst_12 = arith.constant 0.00999999977 : f32
    %26 = vector.broadcast %cst_12 : f32 to vector<256x128xf32>
    %27 = arith.mulf %26, %23 : vector<256x128xf32>
    %28 = arith.select %25, %23, %27 : vector<256x128xi1>, vector<256x128xf32>
    %29 = arith.truncf %28 : vector<256x128xf32> to vector<256x128xbf16>
    %c1 = arith.constant 1 : index
    %c0_13 = arith.constant 0 : index
    %c0_14 = arith.constant 0 : index
    %30 = vector.load %arg3[%c1, %c0_13, %c0_14] : memref<3x128x128xbf16, #tpu.memory_space<vmem>>, vector<1x128x128xbf16>
    %31 = vector.shape_cast %30 : vector<1x128x128xbf16> to vector<128x128xbf16>
    %cst_15 = arith.constant dense<0.000000e+00> : vector<256x128xf32>
    %32 = tpu.matmul %29, %31, %cst_15 {dimension_numbers = #tpu.dot_dimension_numbers<[1], [0], [0], [1], [0, 0, 1, 1], [], []>} : vector<256x128xbf16>, vector<128x128xbf16>, vector<256x128xf32> -> vector<256x128xf32>
    %33 = vector.extract_strided_slice %0 {offsets = [2, 0], sizes = [1, 128], strides = [1, 1]} : vector<4x128xf32> to vector<1x128xf32>
    %34 = vector.shape_cast %33 : vector<1x128xf32> to vector<128xf32>
    %35 = vector.shape_cast %34 : vector<128xf32> to vector<1x128xf32>
    %36 = vector.broadcast %35 : vector<1x128xf32> to vector<256x128xf32>
    %37 = arith.addf %32, %36 : vector<256x128xf32>
    %cst_16 = arith.constant 0.000000e+00 : f32
    %38 = vector.broadcast %cst_16 : f32 to vector<256x128xf32>
    %39 = arith.cmpf ogt, %37, %38 : vector<256x128xf32>
    %cst_17 = arith.constant 0.00999999977 : f32
    %40 = vector.broadcast %cst_17 : f32 to vector<256x128xf32>
    %41 = arith.mulf %40, %37 : vector<256x128xf32>
    %42 = arith.select %39, %37, %41 : vector<256x128xi1>, vector<256x128xf32>
    %43 = arith.truncf %42 : vector<256x128xf32> to vector<256x128xbf16>
    %c2 = arith.constant 2 : index
    %c0_18 = arith.constant 0 : index
    %c0_19 = arith.constant 0 : index
    %44 = vector.load %arg3[%c2, %c0_18, %c0_19] : memref<3x128x128xbf16, #tpu.memory_space<vmem>>, vector<1x128x128xbf16>
    %45 = vector.shape_cast %44 : vector<1x128x128xbf16> to vector<128x128xbf16>
    %cst_20 = arith.constant dense<0.000000e+00> : vector<256x128xf32>
    %46 = tpu.matmul %43, %45, %cst_20 {dimension_numbers = #tpu.dot_dimension_numbers<[1], [0], [0], [1], [0, 0, 1, 1], [], []>} : vector<256x128xbf16>, vector<128x128xbf16>, vector<256x128xf32> -> vector<256x128xf32>
    %47 = vector.extract_strided_slice %0 {offsets = [3, 0], sizes = [1, 128], strides = [1, 1]} : vector<4x128xf32> to vector<1x128xf32>
    %48 = vector.shape_cast %47 : vector<1x128xf32> to vector<128xf32>
    %49 = vector.shape_cast %48 : vector<128xf32> to vector<1x128xf32>
    %50 = vector.broadcast %49 : vector<1x128xf32> to vector<256x128xf32>
    %51 = arith.addf %46, %50 : vector<256x128xf32>
    %cst_21 = arith.constant 0.000000e+00 : f32
    %52 = vector.broadcast %cst_21 : f32 to vector<256x128xf32>
    %53 = arith.cmpf ogt, %51, %52 : vector<256x128xf32>
    %cst_22 = arith.constant 0.00999999977 : f32
    %54 = vector.broadcast %cst_22 : f32 to vector<256x128xf32>
    %55 = arith.mulf %54, %51 : vector<256x128xf32>
    %56 = arith.select %53, %51, %55 : vector<256x128xi1>, vector<256x128xf32>
    %c0_23 = arith.constant 0 : index
    %c0_24 = arith.constant 0 : index
    %57 = vector.load %arg5[%c0_23, %c0_24] : memref<256x128xf32, #tpu.memory_space<vmem>>, vector<256x128xf32>
    tpu.vector_store %arg5[%c0_23, %c0_24], %56 {strides = array<i32>} : memref<256x128xf32, #tpu.memory_space<vmem>>, vector<256x128xf32>,
    return
  }
  func.func @transform_0(%arg0: i32) -> (i32, i32) {
    %c0_i32 = arith.constant 0 : i32
    %c0_i32_0 = arith.constant 0 : i32
    return %arg0, %c0_i32 : i32, i32
  }
  func.func @transform_1(%arg0: i32) -> (i32, i32) {
    %c0_i32 = arith.constant 0 : i32
    %c0_i32_0 = arith.constant 0 : i32
    %c0_i32_1 = arith.constant 0 : i32
    return %c0_i32, %c0_i32_0 : i32, i32
  }
  func.func @transform_2(%arg0: i32) -> (i32, i32, i32) {
    %c0_i32 = arith.constant 0 : i32
    %c0_i32_0 = arith.constant 0 : i32
    %c0_i32_1 = arith.constant 0 : i32
    %c0_i32_2 = arith.constant 0 : i32
    return %c0_i32, %c0_i32_0, %c0_i32_1 : i32, i32, i32
  }
  func.func @transform_3(%arg0: i32) -> (i32, i32) {
    %c0_i32 = arith.constant 0 : i32
    %c0_i32_0 = arith.constant 0 : i32
    %c0_i32_1 = arith.constant 0 : i32
    return %c0_i32, %c0_i32_0 : i32, i32
  }
  func.func @transform_4(%arg0: i32) -> (i32, i32) {
    %c0_i32 = arith.constant 0 : i32
    %c0_i32_0 = arith.constant 0 : i32
    return %arg0, %c0_i32 : i32, i32
  }
}

</mosaic_0001>

<bundles_post_ra>
// kernel: mnist_model_forward.1
= control target key start
LH: loop header
LB: loop body
LE: loop exit
PB: predicated region body
PF: predicated region fallthrough
CT: control target
= control target key end

     0   :  { %vm751_vm0 = vcmask 130048   ;;  %s4745_s1 = inlined_call_operand.vmem [shape: bf16[784,128], index: 1, kind: input, shape index: {}]   ;;  %s4746_s0 = inlined_call_operand.vmem [shape: f32[256,784], index: 0, kind: input, shape index: {}]   ;;  %s4747_s2 = inlined_call_operand.vmem [shape: bf16[3,128,128], index: 2, kind: input, shape index: {}]   ;;  %s4748_s3 = inlined_call_operand.vmem [shape: f32[4,128], index: 3, kind: input, shape index: {}]   ;;  %s4749_s4 = inlined_call_operand.vmem [shape: f32[256,128], index: 4, kind: output, shape index: {}]  }
   0x1   :  { %v3325_v0 = vld [vmem:[%s4745_s1 + $0x40] sm:$0xff]   ;;  %v3329_v4 = vld [vmem:[%s4745_s1 + $0x48] sm:$0xff]   ;;  %v3333_v8 = vld [vmem:[%s4745_s1 + $0x50] sm:$0xff]  }
   0x2   :  { %v3326_v1 = vld [vmem:[%s4745_s1] sm:$0xff]   ;;  %2722 = vmatprep.subr.bf16.mxu0 %v3325_v0  ;;  %v3330_v5 = vld [vmem:[%s4745_s1 + $0x8] sm:$0xff]   ;;  %v3334_v9 = vld [vmem:[%s4745_s1 + $0x10] sm:$0xff]  }
   0x3   :  { %v3327_v2 = vld [vmem:[%s4745_s1 + $0xc0] sm:$0xff]   ;;  %2723 = vmatpush3.bf16.msra.mxu0 %v3326_v1  ;;  %v3331_v6 = vld [vmem:[%s4745_s1 + $0xc8] sm:$0xff]   ;;  %v3335_v10 = vld [vmem:[%s4745_s1 + $0xd0] sm:$0xff]  }
   0x4   :  { %v3328_v3 = vld [vmem:[%s4745_s1 + $0x80] sm:$0xff]   ;;  %2834 = vmatprep.subr.bf16.mxu1 %v3327_v2  ;;  %2724 = vmatprep.subr.bf16.mxu0 %v3329_v4  ;;  %v3332_v7 = vld [vmem:[%s4745_s1 + $0x88] sm:$0xff]   ;;  %v3336_v11 = vld [vmem:[%s4745_s1 + $0x90] sm:$0xff]  }
   0x5   :  { %2835 = vmatpush3.bf16.msra.mxu1 %v3328_v3  ;;  %v3337_v12 = vld [vmem:[%s4745_s1 + $0x58] sm:$0xff]   ;;  %v3341_v16 = vld [vmem:[%s4745_s1 + $0x60] sm:$0xff]   ;;  %v3345_v20 = vld [vmem:[%s4745_s1 + $0x68] sm:$0xff]  }
   0x6   :  { %2836 = vmatprep.subr.bf16.mxu1 %v3331_v6  ;;  %v3338_v13 = vld [vmem:[%s4745_s1 + $0x18] sm:$0xff]   ;;  %v3342_v17 = vld [vmem:[%s4745_s1 + $0x20] sm:$0xff]   ;;  %v3346_v21 = vld [vmem:[%s4745_s1 + $0x28] sm:$0xff]  }
   0x7   :  { %2725 = vmatpush3.bf16.msra.mxu0 %v3330_v5  ;;  %v3339_v14 = vld [vmem:[%s4745_s1 + $0xd8] sm:$0xff]   ;;  %v3343_v18 = vld [vmem:[%s4745_s1 + $0xe0] sm:$0xff]   ;;  %v3347_v22 = vld [vmem:[%s4745_s1 + $0xe8] sm:$0xff]  }
   0x8   :  { %2726 = vmatprep.subr.bf16.mxu0 %v3333_v8  ;;  %v3340_v15 = vld [vmem:[%s4745_s1 + $0x98] sm:$0xff]   ;;  %v3344_v19 = vld [vmem:[%s4745_s1 + $0xa0] sm:$0xff]   ;;  %v3348_v23 = vld [vmem:[%s4745_s1 + $0xa8] sm:$0xff]  }
   0x9   :  { %2837 = vmatpush3.bf16.msra.mxu1 %v3332_v7  ;;  %v3349_v24 = vld [vmem:[%s4745_s1 + $0x70] sm:$0xff]   ;;  %v3353_v28 = vld [vmem:[%s4745_s1 + $0x78] sm:$0xff]   ;;  %v20_v31 = vld [vmem:[%s4746_s0 + $0x8] sm:$0xff] }
   0xa   :  { %2838 = vmatprep.subr.bf16.mxu1 %v3335_v10  ;;  %v3350_v25 = vld [vmem:[%s4745_s1 + $0x30] sm:$0xff]   ;;  %v3354_v29 = vld [vmem:[%s4745_s1 + $0x38] sm:$0xff]   ;;  %v27_v32 = vld [vmem:[%s4746_s0 + $0x40] sm:$0xff] }
   0xb   :  { %2727 = vmatpush3.bf16.msra.mxu0 %v3334_v9  ;;  %v3351_v26 = vld [vmem:[%s4745_s1 + $0xf0] sm:$0xff]   ;;  %v3355_v30 = vld [vmem:[%s4745_s1 + $0xf8] sm:$0xff]   ;;  %v244_v33 = vpack.c.bf16 %v27_v32, %v20_v31  ;;  %v19_v35 = vld [vmem:[%s4746_s0] sm:$0xff] }
   0xc   :  { %2728 = vmatprep.subr.bf16.mxu0 %v3337_v12  ;;  %v3352_v27 = vld [vmem:[%s4745_s1 + $0xb0] sm:$0xff]   ;;  %v3356_v34 = vld [vmem:[%s4745_s1 + $0xb8] sm:$0xff]   ;;  %v3357_v38 = vld [vmem:[%s4745_s1 + $0x140] sm:$0xff]  }
   0xd   :  { %2839 = vmatpush3.bf16.msra.mxu1 %v3336_v11  ;;  %v26_v36 = vld [vmem:[%s4746_s0 + $0x38] sm:$0xff]  ;;  %832 = vmatprep.mubr.bf16.mxu0 %v244_v33  ;;  %v29_v40 = vld [vmem:[%s4746_s0 + $0x50] sm:$0xff]  ;;  %v3358_v42 = vld [vmem:[%s4745_s1 + $0x100] sm:$0xff]  }
   0xe   :  { %2840 = vmatprep.subr.bf16.mxu1 %v3339_v14  ;;  %v243_v37 = vpack.c.bf16 %v26_v36, %v19_v35  ;;  %v22_v39 = vld [vmem:[%s4746_s0 + $0x18] sm:$0xff]  ;;  %v21_v43 = vld [vmem:[%s4746_s0 + $0x10] sm:$0xff]  ;;  %v28_v44 = vld [vmem:[%s4746_s0 + $0x48] sm:$0xff] }
   0xf   :  { %2729 = vmatpush3.bf16.msra.mxu0 %v3338_v13  ;;  %v246_v41 = vpack.c.bf16 %v29_v40, %v22_v39  ;;  %v34_v45 = vld [vmem:[%s4746_s0 + $0x78] sm:$0xff]  ;;  %v245_v46 = vpack.c.bf16 %v28_v44, %v21_v43  ;;  %v41_v47 = vld [vmem:[%s4746_s0 + $0xb0] sm:$0xff]  ;;  %v40_v49 = vld [vmem:[%s4746_s0 + $0xa8] sm:$0xff] }
  0x10   :  { %2730 = vmatprep.subr.bf16.mxu0 %v3341_v16  ;;  %v33_v48 = vld [vmem:[%s4746_s0 + $0x70] sm:$0xff]  ;;  %v251_v50 = vpack.c.bf16 %v41_v47, %v34_v45  ;;  %v36_v51 = vld [vmem:[%s4746_s0 + $0x88] sm:$0xff]  ;;  %v43_v52 = vld [vmem:[%s4746_s0 + $0xc0] sm:$0xff] }
  0x11   :  { %2841 = vmatpush3.bf16.msra.mxu1 %v3340_v15  ;;  %993 = vmatprep.mubr.bf16.mxu1 %v246_v41  ;;  %v253_v53 = vpack.c.bf16 %v43_v52, %v36_v51  ;;  %v48_v54 = vld [vmem:[%s4746_s0 + $0xe8] sm:$0xff]  ;;  %v55_v55 = vld [vmem:[%s4746_s0 + $0x120] sm:$0xff]  ;;  %v250_v56 = vpack.c.bf16 %v40_v49, %v33_v48  ;;  %v42_v58 = vld [vmem:[%s4746_s0 + $0xb8] sm:$0xff] }
  0x12   :  { %2842 = vmatprep.subr.bf16.mxu1 %v3343_v18  ;;  %v35_v57 = vld [vmem:[%s4746_s0 + $0x80] sm:$0xff]  ;;  %v258_v59 = vpack.c.bf16 %v55_v55, %v48_v54  ;;  %v3359_v60 = vld [vmem:[%s4745_s1 + $0x148] sm:$0xff]   ;;  %v50_v61 = vld [vmem:[%s4746_s0 + $0xf8] sm:$0xff] }
  0x13   :  { %2731 = vmatpush3.bf16.msra.mxu0 %v3342_v17  ;;  %v57_v62 = vld [vmem:[%s4746_s0 + $0x130] sm:$0xff]  ;;  %v252_v63 = vpack.c.bf16 %v42_v58, %v35_v57  ;;  %v3360_v0 = vld [vmem:[%s4745_s1 + $0x108] sm:$0xff]   ;;  %v47_v2 = vld [vmem:[%s4746_s0 + $0xe0] sm:$0xff] }
  0x14   :  { %2732 = vmatprep.subr.bf16.mxu0 %v3345_v20  ;;  %v260_v1 = vpack.c.bf16 %v57_v62, %v50_v61  ;;  %v54_v3 = vld [vmem:[%s4746_s0 + $0x118] sm:$0xff]  ;;  %v69_v5 = vld [vmem:[%s4746_s0 + $0x190] sm:$0xff]  ;;  %v56_v7 = vld [vmem:[%s4746_s0 + $0x128] sm:$0xff] }
  0x15   :  { %2843 = vmatpush3.bf16.msra.mxu1 %v3344_v19  ;;  %v62_v4 = vld [vmem:[%s4746_s0 + $0x158] sm:$0xff]  ;;  %v49_v6 = vld [vmem:[%s4746_s0 + $0xf0] sm:$0xff]  ;;  %v257_v8 = vpack.c.bf16 %v54_v3, %v47_v2  ;;  %v64_v11 = vld [vmem:[%s4746_s0 + $0x168] sm:$0xff] }
  0x16   :  { %2844 = vmatprep.subr.bf16.mxu1 %v3347_v22  ;;  %v3361_v9 = vld [vmem:[%s4745_s1 + $0x150] sm:$0xff]   ;;  %v265_v10 = vpack.c.bf16 %v69_v5, %v62_v4  ;;  %v71_v12 = vld [vmem:[%s4746_s0 + $0x1a0] sm:$0xff]  ;;  %v259_v14 = vpack.c.bf16 %v56_v7, %v49_v6  ;;  %v68_v17 = vld [vmem:[%s4746_s0 + $0x188] sm:$0xff] }
  0x17   :  { %2733 = vmatpush3.bf16.msra.mxu0 %v3346_v21  ;;  %v3362_v13 = vld [vmem:[%s4745_s1 + $0x110] sm:$0xff]   ;;  %v267_v15 = vpack.c.bf16 %v71_v12, %v64_v11  ;;  %v63_v18 = vld [vmem:[%s4746_s0 + $0x160] sm:$0xff]  ;;  %v76_v19 = vld [vmem:[%s4746_s0 + $0x1c8] sm:$0xff] }
  0x18   :  { %2734 = vmatprep.subr.bf16.mxu0 %v3349_v24  ;;  %v61_v16 = vld [vmem:[%s4746_s0 + $0x150] sm:$0xff]  ;;  %v83_v20 = vld [vmem:[%s4746_s0 + $0x200] sm:$0xff]  ;;  %v70_v21 = vld [vmem:[%s4746_s0 + $0x198] sm:$0xff] }
  0x19   :  { %2845 = vmatpush3.bf16.msra.mxu1 %v3348_v23  ;;  %v264_v22 = vpack.c.bf16 %v68_v17, %v61_v16  ;;  %v78_v23 = vld [vmem:[%s4746_s0 + $0x1d8] sm:$0xff]  ;;  %v85_v24 = vld [vmem:[%s4746_s0 + $0x210] sm:$0xff]  ;;  %v3365_v35 = vld [vmem:[%s4745_s1 + $0x160] sm:$0xff]  }
  0x1a   :  { %2846 = vmatprep.subr.bf16.mxu1 %v3351_v26  ;;  %v272_v26 = vpack.c.bf16 %v83_v20, %v76_v19  ;;  %v82_v31 = vld [vmem:[%s4746_s0 + $0x1f8] sm:$0xff]  ;;  %v97_v33 = vld [vmem:[%s4746_s0 + $0x270] sm:$0xff]  ;;  %v92_v39 = vld [vmem:[%s4746_s0 + $0x248] sm:$0xff] }
  0x1b   :  { %2735 = vmatpush3.bf16.msra.mxu0 %v3350_v25  ;;  %v3363_v25 = vld [vmem:[%s4745_s1 + $0x158] sm:$0xff]   ;;  %v99_v40 = vld [vmem:[%s4746_s0 + $0x280] sm:$0xff]  ;;  %v89_v45 = vld [vmem:[%s4746_s0 + $0x230] sm:$0xff] }
  0x1c   :  { %2736 = vmatprep.subr.bf16.mxu0 %v3353_v28  ;;  %v266_v28 = vpack.c.bf16 %v70_v21, %v63_v18  ;;  %v90_v32 = vld [vmem:[%s4746_s0 + $0x238] sm:$0xff]  ;;  %v3366_v41 = vld [vmem:[%s4745_s1 + $0x120] sm:$0xff]   ;;  %v281_v44 = vpack.c.bf16 %v99_v40, %v92_v39  ;;  %v104_v48 = vld [vmem:[%s4746_s0 + $0x2a8] sm:$0xff] }
  0x1d   :  { %2847 = vmatpush3.bf16.msra.mxu1 %v3352_v27  ;;  %v3364_v27 = vld [vmem:[%s4745_s1 + $0x118] sm:$0xff]   ;;  %v91_v47 = vld [vmem:[%s4746_s0 + $0x240] sm:$0xff]  ;;  %v113_v55 = vld [vmem:[%s4746_s0 + $0x2f0] sm:$0xff] }
  0x1e   :  { %2848 = vmatprep.subr.bf16.mxu1 %v3355_v30  ;;  %v75_v30 = vld [vmem:[%s4746_s0 + $0x1c0] sm:$0xff]  ;;  %v98_v52 = vld [vmem:[%s4746_s0 + $0x278] sm:$0xff]  ;;  %v125_v62 = vld [vmem:[%s4746_s0 + $0x350] sm:$0xff] }
  0x1f   :  { %2737 = vmatpush3.bf16.msra.mxu0 %v3354_v29  ;;  %v274_v29 = vpack.c.bf16 %v85_v24, %v78_v23  ;;  %v271_v36 = vpack.c.bf16 %v82_v31, %v75_v30  ;;  %v111_v49 = vld [vmem:[%s4746_s0 + $0x2e0] sm:$0xff]  ;;  %v280_v57 = vpack.c.bf16 %v98_v52, %v91_v47  ;;  %v118_v61 = vld [vmem:[%s4746_s0 + $0x318] sm:$0xff]  ;;  %v3371_v3 = vld [vmem:[%s4745_s1 + $0x130] sm:$0xff]  }
  0x20   :  { %2946 = vmatprep.subr.bf16.mxu0 %v3357_v38  ;;  %v279_v38 = vpack.c.bf16 %v97_v33, %v90_v32  ;;  %v286_v54 = vpack.c.bf16 %v111_v49, %v104_v48  ;;  %v293_v4 = vpack.c.bf16 %v125_v62, %v118_v61  ;;  %v120_v5 = vld [vmem:[%s4746_s0 + $0x328] sm:$0xff]  ;;  %v127_v6 = vld [vmem:[%s4746_s0 + $0x360] sm:$0xff]  ;;  %v126_v16 = vld [vmem:[%s4746_s0 + $0x358] sm:$0xff] }
  0x21   :  { %2849 = vmatpush3.bf16.msra.mxu1 %v3356_v34  ;;  %v77_v34 = vld [vmem:[%s4746_s0 + $0x1d0] sm:$0xff]  ;;  %v132_v11 = vld [vmem:[%s4746_s0 + $0x388] sm:$0xff]  ;;  %v139_v12 = vld [vmem:[%s4746_s0 + $0x3c0] sm:$0xff] }
  0x22   :  { %833 = vmatmul.mubr.bf16.vlgmr.msra.gmra.mrb[0].mxu0 %v243_v37  ;;  %v84_v37 = vld [vmem:[%s4746_s0 + $0x208] sm:$0xff]  ;;  %v3373_v17 = vld [vmem:[%s4745_s1 + $0x138] sm:$0xff]   ;;  %v300_v18 = vpack.c.bf16 %v139_v12, %v132_v11  ;;  %v141_v20 = vld [vmem:[%s4746_s0 + $0x3d0] sm:$0xff] }
  0x23   :  { %2947 = vmatpush3.bf16.msra.mxu0 %v3358_v42  ;;  %840 = vmatprep.mubr.bf16.mxu0 %v251_v50  ;;  %v3367_v42 = vld [vmem:[%s4745_s1 + $0x180] sm:$0xff]   ;;  %v273_v43 = vpack.c.bf16 %v84_v37, %v77_v34  ;;  %v3368_v50 = vld [vmem:[%s4745_s1 + $0x168] sm:$0xff]   ;;  %v134_v19 = vld [vmem:[%s4746_s0 + $0x398] sm:$0xff] }
  0x24   :  { %994 = vmatmul.mubr.bf16.vlgmr.msra.gmra.mrb[0].mxu1 %v245_v46  ;;  %2948 = vmatprep.subr.bf16.mxu0 %v3359_v60  ;;  %v96_v46 = vld [vmem:[%s4746_s0 + $0x268] sm:$0xff]  ;;  %v110_v60 = vld [vmem:[%s4746_s0 + $0x2d8] sm:$0xff]  ;;  %v131_v23 = vld [vmem:[%s4746_s0 + $0x380] sm:$0xff] }
  0x25   :  { %1001 = vmatprep.mubr.bf16.mxu1 %v253_v53  ;;  %3147 = vmatprep.subr.bf16.mxu1 %v3367_v42  ;;  %v278_v51 = vpack.c.bf16 %v96_v46, %v89_v45  ;;  %v106_v53 = vld [vmem:[%s4746_s0 + $0x2b8] sm:$0xff]  ;;  %v148_v31 = vld [vmem:[%s4746_s0 + $0x408] sm:$0xff]  ;;  %v155_v32 = vld [vmem:[%s4746_s0 + $0x440] sm:$0xff] }
  0x26   :  { %3148 = vmatpush3.bf16.msra.mxu1 %v3367_v42  ;;  %v288_v58 = vpack.c.bf16 %v113_v55, %v106_v53  ;;  %v138_v24 = vld [vmem:[%s4746_s0 + $0x3b8] sm:$0xff]  ;;  %v309_v34 = vpack.c.bf16 %v155_v32, %v148_v31  ;;  %v160_v37 = vld [vmem:[%s4746_s0 + $0x468] sm:$0xff]  ;;  %v147_v40 = vld [vmem:[%s4746_s0 + $0x400] sm:$0xff] }
  0x27   :  { %2949 = vmatpush3.bf16.msra.mxu0 %v3360_v0  ;;  %v112_v0 = vld [vmem:[%s4746_s0 + $0x2e8] sm:$0xff]  ;;  %v159_v47 = vld [vmem:[%s4746_s0 + $0x460] sm:$0xff]  ;;  %v166_v48 = vld [vmem:[%s4746_s0 + $0x498] sm:$0xff] }
  0x28   :  { %2950 = vmatprep.subr.bf16.mxu0 %v3361_v9  ;;  %v295_v9 = vpack.c.bf16 %v127_v6, %v120_v5  ;;  %v174_v49 = vld [vmem:[%s4746_s0 + $0x4d8] sm:$0xff]  ;;  %v161_v52 = vld [vmem:[%s4746_s0 + $0x470] sm:$0xff]  ;;  %v168_v53 = vld [vmem:[%s4746_s0 + $0x4a8] sm:$0xff] }
  0x29   :  { %v176_v55 = vld [vmem:[%s4746_s0 + $0x4e8] sm:$0xff]  ;;  %v195_v62 = vld [vmem:[%s4746_s0 + $0x580] sm:$0xff]  ;;  %v189_v12 = vld [vmem:[%s4746_s0 + $0x550] sm:$0xff] }
  0x2a   :  { %841 = vmatmul.mubr.bf16.gmra.mrb[4].mxu0 %v250_v56  ;;  %v3369_v56 = vld [vmem:[%s4745_s1 + $0x128] sm:$0xff]   ;;  %v215_v31 = vld [vmem:[%s4746_s0 + $0x620] sm:$0xff]  ;;  %v222_v32 = vld [vmem:[%s4746_s0 + $0x658] sm:$0xff] }
  0x2b   :  { %848 = vmatprep.mubr.bf16.mxu0 %v258_v59  ;;  %2951 = vmatpush3.bf16.msra.mxu0 %v3362_v13  ;;  %v103_v59 = vld [vmem:[%s4746_s0 + $0x2a0] sm:$0xff]  ;;  %v3372_v13 = vld [vmem:[%s4745_s1 + $0x178] sm:$0xff]   ;;  %v188_v61 = vld [vmem:[%s4746_s0 + $0x548] sm:$0xff] }
  0x2c   :  { %1002 = vmatmul.mubr.bf16.gmra.mrb[4].mxu1 %v252_v63  ;;  %2952 = vmatprep.subr.bf16.mxu0 %v3363_v25  ;;  %v105_v63 = vld [vmem:[%s4746_s0 + $0x2b0] sm:$0xff]  ;;  %v285_v2 = vpack.c.bf16 %v110_v60, %v103_v59  ;;  %v146_v25 = vld [vmem:[%s4746_s0 + $0x3f8] sm:$0xff]  ;;  %v180_v60 = vld [vmem:[%s4746_s0 + $0x508] sm:$0xff] }
  0x2d   :  { %1009 = vmatprep.mubr.bf16.mxu1 %v260_v1  ;;  %v3370_v1 = vld [vmem:[%s4745_s1 + $0x170] sm:$0xff]   ;;  %v287_v7 = vpack.c.bf16 %v112_v0, %v105_v63  ;;  %v175_v0 = vld [vmem:[%s4746_s0 + $0x4e0] sm:$0xff] }
  0x2e   :  { %v173_v59 = vld [vmem:[%s4746_s0 + $0x4d0] sm:$0xff] }
  0x2f   :  { %2953 = vmatpush3.bf16.msra.mxu0 %v3364_v27  ;;  %v299_v27 = vpack.c.bf16 %v138_v24, %v131_v23  ;;  %v320_v63 = vpack.c.bf16 %v180_v60, %v173_v59  ;;  %v203_v24 = vld [vmem:[%s4746_s0 + $0x5c0] sm:$0xff] }
  0x30   :  { %2954 = vmatprep.subr.bf16.mxu0 %v3365_v35  ;;  %v145_v35 = vld [vmem:[%s4746_s0 + $0x3f0] sm:$0xff]  ;;  %v39_v60 = vld [vmem:[%s4746_s0 + $0xa0] sm:$0xff] }
  0x32   :  { %849 = vmatmul.mubr.bf16.gmra.mrb[8].mxu0 %v257_v8  ;;  %v117_v8 = vld [vmem:[%s4746_s0 + $0x310] sm:$0xff] }
  0x33   :  { %856 = vmatprep.mubr.bf16.mxu0 %v265_v10  ;;  %2955 = vmatpush3.bf16.msra.mxu0 %v3366_v41  ;;  %v124_v10 = vld [vmem:[%s4746_s0 + $0x348] sm:$0xff]  ;;  %v154_v41 = vld [vmem:[%s4746_s0 + $0x438] sm:$0xff] }
  0x34   :  { %1010 = vmatmul.mubr.bf16.gmra.mrb[8].mxu1 %v259_v14  ;;  %2956 = vmatprep.subr.bf16.mxu0 %v3368_v50  ;;  %v292_v14 = vpack.c.bf16 %v124_v10, %v117_v8  ;;  %v308_v45 = vpack.c.bf16 %v154_v41, %v147_v40  ;;  %v181_v50 = vld [vmem:[%s4746_s0 + $0x510] sm:$0xff]  ;;  %v194_v8 = vld [vmem:[%s4746_s0 + $0x578] sm:$0xff]  ;;  %v239_v40 = vld [vmem:[%s4746_s0 + $0x6e0] sm:$0xff] }
  0x35   :  { %1017 = vmatprep.mubr.bf16.mxu1 %v267_v15  ;;  %v119_v15 = vld [vmem:[%s4746_s0 + $0x320] sm:$0xff]  ;;  %v209_v10 = vld [vmem:[%s4746_s0 + $0x5f0] sm:$0xff] }
  0x36   :  { %v294_v21 = vpack.c.bf16 %v126_v16, %v119_v15  ;;  %v204_v15 = vld [vmem:[%s4746_s0 + $0x5c8] sm:$0xff]  ;;  %v211_v16 = vld [vmem:[%s4746_s0 + $0x600] sm:$0xff] }
  0x37   :  { %2957 = vmatpush3.bf16.msra.mxu0 %v3369_v56  ;;  %v183_v56 = vld [vmem:[%s4746_s0 + $0x520] sm:$0xff] }
  0x38   :  { %2958 = vmatprep.subr.bf16.mxu0 %v3370_v1  ;;  %v182_v1 = vld [vmem:[%s4746_s0 + $0x518] sm:$0xff] }
  0x39   :  { %v322_v5 = vpack.c.bf16 %v182_v1, %v175_v0  ;;  %v60_v0 = vld [vmem:[%s4746_s0 + $0x148] sm:$0xff] }
  0x3a   :  { %857 = vmatmul.mubr.bf16.gmra.mrb[12].mxu0 %v264_v22  ;;  %v302_v22 = vpack.c.bf16 %v141_v20, %v134_v19  ;;  %v201_v19 = vld [vmem:[%s4746_s0 + $0x5b0] sm:$0xff]  ;;  %v208_v20 = vld [vmem:[%s4746_s0 + $0x5e8] sm:$0xff] }
  0x3b   :  { %864 = vmatprep.mubr.bf16.mxu0 %v272_v26  ;;  %2959 = vmatpush3.bf16.msra.mxu0 %v3371_v3  ;;  %v153_v26 = vld [vmem:[%s4746_s0 + $0x430] sm:$0xff]  ;;  %v190_v3 = vld [vmem:[%s4746_s0 + $0x558] sm:$0xff]  ;;  %v334_v23 = vpack.c.bf16 %v208_v20, %v201_v19  ;;  %v95_v20 = vld [vmem:[%s4746_s0 + $0x260] sm:$0xff] }
  0x3c   :  { %1018 = vmatmul.mubr.bf16.gmra.mrb[12].mxu1 %v266_v28  ;;  %2960 = vmatprep.subr.bf16.mxu0 %v3372_v13  ;;  %v133_v28 = vld [vmem:[%s4746_s0 + $0x390] sm:$0xff]  ;;  %v307_v30 = vpack.c.bf16 %v153_v26, %v146_v25  ;;  %v196_v13 = vld [vmem:[%s4746_s0 + $0x588] sm:$0xff]  ;;  %v210_v25 = vld [vmem:[%s4746_s0 + $0x5f8] sm:$0xff] }
  0x3d   :  { %1025 = vmatprep.mubr.bf16.mxu1 %v274_v29  ;;  %v140_v29 = vld [vmem:[%s4746_s0 + $0x3c8] sm:$0xff] }
  0x3e   :  { %v301_v33 = vpack.c.bf16 %v140_v29, %v133_v28  ;;  %v225_v28 = vld [vmem:[%s4746_s0 + $0x670] sm:$0xff]  ;;  %v336_v29 = vpack.c.bf16 %v210_v25, %v203_v24  ;;  %v116_v24 = vld [vmem:[%s4746_s0 + $0x308] sm:$0xff] }
  0x3f   :  { %2961 = vmatpush3.bf16.msra.mxu0 %v3373_v17  ;;  %v329_v17 = vpack.c.bf16 %v196_v13, %v189_v12  ;;  %v88_v12 = vld [vmem:[%s4746_s0 + $0x228] sm:$0xff] }
  0x42   :  { %865 = vmatmul.mubr.bf16.gmra.mrb[16].mxu0 %v271_v36  ;;  %v152_v36 = vld [vmem:[%s4746_s0 + $0x428] sm:$0xff] }
  0x43   :  { %872 = vmatprep.mubr.bf16.mxu0 %v279_v38  ;;  %v167_v38 = vld [vmem:[%s4746_s0 + $0x4a0] sm:$0xff]  ;;  %v306_v39 = vpack.c.bf16 %v152_v36, %v145_v35  ;;  %v341_v35 = vpack.c.bf16 %v222_v32, %v215_v31  ;;  %v217_v36 = vld [vmem:[%s4746_s0 + $0x630] sm:$0xff] }
  0x44   :  { %1026 = vmatmul.mubr.bf16.gmra.mrb[16].mxu1 %v273_v43  ;;  %v314_v42 = vpack.c.bf16 %v167_v38, %v160_v37  ;;  %v162_v43 = vld [vmem:[%s4746_s0 + $0x478] sm:$0xff]  ;;  %v224_v37 = vld [vmem:[%s4746_s0 + $0x668] sm:$0xff]  ;;  %v123_v32 = vld [vmem:[%s4746_s0 + $0x340] sm:$0xff] }
  0x45   :  { %1033 = vmatprep.mubr.bf16.mxu1 %v281_v44  ;;  %v169_v44 = vld [vmem:[%s4746_s0 + $0x4b0] sm:$0xff]  ;;  %v343_v41 = vpack.c.bf16 %v224_v37, %v217_v36  ;;  %v144_v36 = vld [vmem:[%s4746_s0 + $0x3e8] sm:$0xff] }
  0x46   :  { %v316_v46 = vpack.c.bf16 %v169_v44, %v162_v43  ;;  %v229_v43 = vld [vmem:[%s4746_s0 + $0x690] sm:$0xff]  ;;  %v236_v44 = vld [vmem:[%s4746_s0 + $0x6c8] sm:$0xff] }
  0x4a   :  { %873 = vmatmul.mubr.bf16.gmra.mrb[20].mxu0 %v278_v51  ;;  %v313_v51 = vpack.c.bf16 %v166_v48, %v159_v47  ;;  %v348_v47 = vpack.c.bf16 %v236_v44, %v229_v43  ;;  %v231_v48 = vld [vmem:[%s4746_s0 + $0x6a0] sm:$0xff] }
  0x4b   :  { %880 = vmatprep.mubr.bf16.mxu0 %v286_v54  ;;  %v321_v54 = vpack.c.bf16 %v181_v50, %v174_v49  ;;  %v238_v49 = vld [vmem:[%s4746_s0 + $0x6d8] sm:$0xff]  ;;  %v151_v44 = vld [vmem:[%s4746_s0 + $0x420] sm:$0xff] }
  0x4c   :  { %1034 = vmatmul.mubr.bf16.gmra.mrb[20].mxu1 %v280_v57  ;;  %v315_v57 = vpack.c.bf16 %v168_v53, %v161_v52  ;;  %v32_v52 = vld [vmem:[%s4746_s0 + $0x68] sm:$0xff]  ;;  %v350_v53 = vpack.c.bf16 %v238_v49, %v231_v48 }
  0x4d   :  { %1041 = vmatprep.mubr.bf16.mxu1 %v288_v58  ;;  %v323_v58 = vpack.c.bf16 %v183_v56, %v176_v55  ;;  %v23_v55 = vld [vmem:[%s4746_s0 + $0x20] sm:$0xff]  ;;  %v30_v56 = vld [vmem:[%s4746_s0 + $0x58] sm:$0xff]  ;;  %v172_v48 = vld [vmem:[%s4746_s0 + $0x4c8] sm:$0xff] }
  0x4e   :  { %v247_v59 = vpack.c.bf16 %v30_v56, %v23_v55  ;;  %v179_v56 = vld [vmem:[%s4746_s0 + $0x500] sm:$0xff] }
  0x52   :  { %881 = vmatmul.mubr.bf16.gmra.mrb[24].mxu0 %v285_v2  ;;  %v328_v2 = vpack.c.bf16 %v195_v62, %v188_v61  ;;  %v46_v61 = vld [vmem:[%s4746_s0 + $0xd8] sm:$0xff] }
  0x53   :  { %888 = vmatprep.mubr.bf16.mxu0 %v293_v4  ;;  %v197_v4 = vld [vmem:[%s4746_s0 + $0x590] sm:$0xff]  ;;  %v256_v1 = vpack.c.bf16 %v46_v61, %v39_v60  ;;  %v200_v60 = vld [vmem:[%s4746_s0 + $0x5a8] sm:$0xff] }
  0x54   :  { %1042 = vmatmul.mubr.bf16.gmra.mrb[24].mxu1 %v287_v7  ;;  %v330_v6 = vpack.c.bf16 %v197_v4, %v190_v3  ;;  %v187_v7 = vld [vmem:[%s4746_s0 + $0x540] sm:$0xff]  ;;  %v37_v3 = vld [vmem:[%s4746_s0 + $0x90] sm:$0xff]  ;;  %v44_v4 = vld [vmem:[%s4746_s0 + $0xc8] sm:$0xff] }
  0x55   :  { %1049 = vmatprep.mubr.bf16.mxu1 %v295_v9  ;;  %v202_v9 = vld [vmem:[%s4746_s0 + $0x5b8] sm:$0xff]  ;;  %v327_v11 = vpack.c.bf16 %v194_v8, %v187_v7  ;;  %v254_v7 = vpack.c.bf16 %v44_v4, %v37_v3  ;;  %v67_v8 = vld [vmem:[%s4746_s0 + $0x180] sm:$0xff] }
  0x56   :  { %v207_v4 = vld [vmem:[%s4746_s0 + $0x5e0] sm:$0xff] }
  0x5a   :  { %889 = vmatmul.mubr.bf16.gmra.mrb[28].mxu0 %v292_v14  ;;  %v335_v14 = vpack.c.bf16 %v209_v10, %v202_v9  ;;  %v74_v9 = vld [vmem:[%s4746_s0 + $0x1b8] sm:$0xff] }
  0x5b   :  { %896 = vmatprep.mubr.bf16.mxu0 %v300_v18  ;;  %v337_v18 = vpack.c.bf16 %v211_v16, %v204_v15  ;;  %v270_v13 = vpack.c.bf16 %v74_v9, %v67_v8  ;;  %v51_v15 = vld [vmem:[%s4746_s0 + $0x100] sm:$0xff]  ;;  %v58_v16 = vld [vmem:[%s4746_s0 + $0x138] sm:$0xff]  ;;  %v228_v8 = vld [vmem:[%s4746_s0 + $0x688] sm:$0xff] }
  0x5c   :  { %1050 = vmatmul.mubr.bf16.gmra.mrb[28].mxu1 %v294_v21  ;;  %v216_v21 = vld [vmem:[%s4746_s0 + $0x628] sm:$0xff]  ;;  %v261_v19 = vpack.c.bf16 %v58_v16, %v51_v15  ;;  %v235_v16 = vld [vmem:[%s4746_s0 + $0x6c0] sm:$0xff] }
  0x5d   :  { %1057 = vmatprep.mubr.bf16.mxu1 %v302_v22  ;;  %v223_v22 = vld [vmem:[%s4746_s0 + $0x660] sm:$0xff] }
  0x5e   :  { %v342_v26 = vpack.c.bf16 %v223_v22, %v216_v21  ;;  %v102_v21 = vld [vmem:[%s4746_s0 + $0x298] sm:$0xff] }
  0x5f   :  { %v284_v25 = vpack.c.bf16 %v102_v21, %v95_v20  ;;  %v135_v20 = vld [vmem:[%s4746_s0 + $0x3a0] sm:$0xff]  ;;  %v142_v21 = vld [vmem:[%s4746_s0 + $0x3d8] sm:$0xff] }
  0x62   :  { %897 = vmatmul.mubr.bf16.gmra.mrb[32].mxu0 %v299_v27  ;;  %v218_v27 = vld [vmem:[%s4746_s0 + $0x638] sm:$0xff] }
  0x63   :  { %904 = vmatprep.mubr.bf16.mxu0 %v307_v30  ;;  %v344_v30 = vpack.c.bf16 %v225_v28, %v218_v27  ;;  %v65_v27 = vld [vmem:[%s4746_s0 + $0x170] sm:$0xff]  ;;  %v72_v28 = vld [vmem:[%s4746_s0 + $0x1a8] sm:$0xff] }
  0x64   :  { %1058 = vmatmul.mubr.bf16.gmra.mrb[32].mxu1 %v301_v33  ;;  %v230_v33 = vld [vmem:[%s4746_s0 + $0x698] sm:$0xff]  ;;  %v268_v31 = vpack.c.bf16 %v72_v28, %v65_v27  ;;  %v156_v27 = vld [vmem:[%s4746_s0 + $0x448] sm:$0xff] }
  0x65   :  { %1065 = vmatprep.mubr.bf16.mxu1 %v309_v34  ;;  %v237_v34 = vld [vmem:[%s4746_s0 + $0x6d0] sm:$0xff]  ;;  %v164_v28 = vld [vmem:[%s4746_s0 + $0x488] sm:$0xff] }
  0x66   :  { %v349_v38 = vpack.c.bf16 %v237_v34, %v230_v33  ;;  %v130_v33 = vld [vmem:[%s4746_s0 + $0x378] sm:$0xff] }
  0x67   :  { %v298_v37 = vpack.c.bf16 %v130_v33, %v123_v32  ;;  %v453_v32 = vlaneseq  ;;  %v163_v33 = vld [vmem:[%s4746_s0 + $0x480] sm:$0xff] }
  0x6a   :  { %905 = vmatmul.mubr.bf16.gmra.mrb[36].mxu0 %v306_v39  ;;  %v232_v39 = vld [vmem:[%s4746_s0 + $0x6a8] sm:$0xff] }
  0x6b   :  { %912 = vmatprep.mubr.bf16.mxu0 %v314_v42  ;;  %v351_v42 = vpack.c.bf16 %v239_v40, %v232_v39  ;;  %v79_v39 = vld [vmem:[%s4746_s0 + $0x1e0] sm:$0xff]  ;;  %v86_v40 = vld [vmem:[%s4746_s0 + $0x218] sm:$0xff] }
  0x6c   :  { %1066 = vmatmul.mubr.bf16.gmra.mrb[36].mxu1 %v308_v45  ;;  %v24_v45 = vld [vmem:[%s4746_s0 + $0x28] sm:$0xff]  ;;  %v275_v43 = vpack.c.bf16 %v86_v40, %v79_v39 }
  0x6d   :  { %1073 = vmatprep.mubr.bf16.mxu1 %v316_v46  ;;  %v31_v46 = vld [vmem:[%s4746_s0 + $0x60] sm:$0xff] }
  0x6e   :  { %v248_v50 = vpack.c.bf16 %v31_v46, %v24_v45  ;;  %v158_v45 = vld [vmem:[%s4746_s0 + $0x458] sm:$0xff] }
  0x6f   :  { %v312_v49 = vpack.c.bf16 %v158_v45, %v151_v44  ;;  %v177_v44 = vld [vmem:[%s4746_s0 + $0x4f0] sm:$0xff]  ;;  %v184_v45 = vld [vmem:[%s4746_s0 + $0x528] sm:$0xff] }
  0x72   :  { %913 = vmatmul.mubr.bf16.gmra.mrb[40].mxu0 %v313_v51  ;;  %v25_v51 = vld [vmem:[%s4746_s0 + $0x30] sm:$0xff] }
  0x73   :  { %920 = vmatprep.mubr.bf16.mxu0 %v321_v54  ;;  %v249_v54 = vpack.c.bf16 %v32_v52, %v25_v51  ;;  %v93_v51 = vld [vmem:[%s4746_s0 + $0x250] sm:$0xff]  ;;  %v100_v52 = vld [vmem:[%s4746_s0 + $0x288] sm:$0xff] }
  0x74   :  { %1074 = vmatmul.mubr.bf16.gmra.mrb[40].mxu1 %v315_v57  ;;  %v38_v57 = vld [vmem:[%s4746_s0 + $0x98] sm:$0xff]  ;;  %v282_v55 = vpack.c.bf16 %v100_v52, %v93_v51  ;;  %v324_v52 = vpack.c.bf16 %v184_v45, %v177_v44 }
  0x75   :  { %1081 = vmatprep.mubr.bf16.mxu1 %v323_v58  ;;  %v45_v58 = vld [vmem:[%s4746_s0 + $0xd0] sm:$0xff] }
  0x76   :  { %v255_v62 = vpack.c.bf16 %v45_v58, %v38_v57  ;;  %v186_v57 = vld [vmem:[%s4746_s0 + $0x538] sm:$0xff] }
  0x77   :  { %v326_v61 = vpack.c.bf16 %v186_v57, %v179_v56  ;;  %v3377_v56 = vld [vmem:[%s4747_s2 + $0x18] sm:$0xff]  }
  0x7a   :  { %921 = vmatmul.mubr.bf16.gmra.mrb[44].mxu0 %v320_v63  ;;  %v53_v63 = vld [vmem:[%s4746_s0 + $0x110] sm:$0xff] }
  0x7b   :  { %928 = vmatprep.mubr.bf16.mxu0 %v328_v2  ;;  %v263_v2 = vpack.c.bf16 %v60_v0, %v53_v63  ;;  %v107_v63 = vld [vmem:[%s4746_s0 + $0x2c0] sm:$0xff]  ;;  %v114_v0 = vld [vmem:[%s4746_s0 + $0x2f8] sm:$0xff] }
  0x7c   :  { %1082 = vmatmul.mubr.bf16.gmra.mrb[44].mxu1 %v322_v5  ;;  %v52_v5 = vld [vmem:[%s4746_s0 + $0x108] sm:$0xff]  ;;  %v289_v3 = vpack.c.bf16 %v114_v0, %v107_v63  ;;  %v198_v63 = vld [vmem:[%s4746_s0 + $0x598] sm:$0xff] }
  0x7d   :  { %1089 = vmatprep.mubr.bf16.mxu1 %v330_v6  ;;  %v59_v6 = vld [vmem:[%s4746_s0 + $0x140] sm:$0xff] }
  0x7e   :  { %v262_v10 = vpack.c.bf16 %v59_v6, %v52_v5  ;;  %v214_v5 = vld [vmem:[%s4746_s0 + $0x618] sm:$0xff] }
  0x7f   :  { %v340_v9 = vpack.c.bf16 %v214_v5, %v207_v4 }
  0x82   :  { %929 = vmatmul.mubr.bf16.gmra.mrb[48].mxu0 %v327_v11  ;;  %v81_v11 = vld [vmem:[%s4746_s0 + $0x1f0] sm:$0xff] }
  0x83   :  { %936 = vmatprep.mubr.bf16.mxu0 %v335_v14  ;;  %v277_v14 = vpack.c.bf16 %v88_v12, %v81_v11  ;;  %v121_v11 = vld [vmem:[%s4746_s0 + $0x330] sm:$0xff]  ;;  %v128_v12 = vld [vmem:[%s4746_s0 + $0x368] sm:$0xff] }
  0x84   :  { %1090 = vmatmul.mubr.bf16.gmra.mrb[48].mxu1 %v329_v17  ;;  %v66_v17 = vld [vmem:[%s4746_s0 + $0x178] sm:$0xff]  ;;  %v296_v15 = vpack.c.bf16 %v128_v12, %v121_v11 }
  0x85   :  { %1097 = vmatprep.mubr.bf16.mxu1 %v337_v18  ;;  %v73_v18 = vld [vmem:[%s4746_s0 + $0x1b0] sm:$0xff] }
  0x86   :  { %v269_v22 = vpack.c.bf16 %v73_v18, %v66_v17  ;;  %v242_v17 = vld [vmem:[%s4746_s0 + $0x6f8] sm:$0xff] }
  0x8a   :  { %937 = vmatmul.mubr.bf16.gmra.mrb[52].mxu0 %v334_v23  ;;  %v109_v23 = vld [vmem:[%s4746_s0 + $0x2d0] sm:$0xff] }
  0x8b   :  { %944 = vmatprep.mubr.bf16.mxu0 %v342_v26  ;;  %v291_v26 = vpack.c.bf16 %v116_v24, %v109_v23  ;;  %v157_v23 = vld [vmem:[%s4746_s0 + $0x450] sm:$0xff]  ;;  %v303_v24 = vpack.c.bf16 %v142_v21, %v135_v20 }
  0x8c   :  { %1098 = vmatmul.mubr.bf16.gmra.mrb[52].mxu1 %v336_v29  ;;  %v80_v29 = vld [vmem:[%s4746_s0 + $0x1e8] sm:$0xff] }
  0x8d   :  { %1105 = vmatprep.mubr.bf16.mxu1 %v344_v30  ;;  %v87_v30 = vld [vmem:[%s4746_s0 + $0x220] sm:$0xff] }
  0x8e   :  { %v276_v34 = vpack.c.bf16 %v87_v30, %v80_v29  ;;  %v171_v29 = vld [vmem:[%s4746_s0 + $0x4c0] sm:$0xff] }
  0x92   :  { %945 = vmatmul.mubr.bf16.gmra.mrb[56].mxu0 %v341_v35  ;;  %v137_v35 = vld [vmem:[%s4746_s0 + $0x3b0] sm:$0xff] }
  0x93   :  { %952 = vmatprep.mubr.bf16.mxu0 %v349_v38  ;;  %v305_v38 = vpack.c.bf16 %v144_v36, %v137_v35  ;;  %v178_v35 = vld [vmem:[%s4746_s0 + $0x4f8] sm:$0xff]  ;;  %v185_v36 = vld [vmem:[%s4746_s0 + $0x530] sm:$0xff] }
  0x94   :  { %1106 = vmatmul.mubr.bf16.gmra.mrb[56].mxu1 %v343_v41  ;;  %v94_v41 = vld [vmem:[%s4746_s0 + $0x258] sm:$0xff] }
  0x95   :  { %1113 = vmatprep.mubr.bf16.mxu1 %v351_v42  ;;  %v101_v42 = vld [vmem:[%s4746_s0 + $0x290] sm:$0xff] }
  0x96   :  { %v283_v46 = vpack.c.bf16 %v101_v42, %v94_v41  ;;  %v325_v41 = vpack.c.bf16 %v185_v36, %v178_v35  ;;  %v3375_v42 = vld [vmem:[%s4747_s2 + $0x8] sm:$0xff]  }
  0x9a   :  { %953 = vmatmul.mubr.bf16.gmra.mrb[60].mxu0 %v348_v47  ;;  %v165_v47 = vld [vmem:[%s4746_s0 + $0x490] sm:$0xff] }
  0x9b   :  { %1154 = vmatprep.mubr.bf16.mxu0 %v248_v50  ;;  %v319_v50 = vpack.c.bf16 %v172_v48, %v165_v47  ;;  %v199_v47 = vld [vmem:[%s4746_s0 + $0x5a0] sm:$0xff]  ;;  %v3376_v48 = vld [vmem:[%s4747_s2 + $0x10] sm:$0xff]  }
  0x9c   :  { %1114 = vmatmul.mubr.bf16.gmra.mrb[60].mxu1 %v350_v53  ;;  %v108_v53 = vld [vmem:[%s4746_s0 + $0x2c8] sm:$0xff] }
  0x9d   :  { %3149 = vmatprep.mubr.msk.bf16.mxu1 %vm751_vm0, %v249_v54  ;;  %v115_v54 = vld [vmem:[%s4746_s0 + $0x300] sm:$0xff] }
  0x9e   :  { %v290_v58 = vpack.c.bf16 %v115_v54, %v108_v53 }
  0xa2   :  { %1155 = vmatmul.mubr.bf16.vlgmr.msra.gmra.mrb[64].mxu0 %v247_v59  ;;  %v193_v59 = vld [vmem:[%s4746_s0 + $0x570] sm:$0xff] }
  0xa3   :  { %1162 = vmatprep.mubr.bf16.mxu0 %v255_v62  ;;  %v333_v62 = vpack.c.bf16 %v200_v60, %v193_v59 }
  0xa4   :  { %3150 = vmatmul.mubr.msk.bf16.vlgmr.msra.gmra.mrb[64].mxu1 %vm751_vm0, %v256_v1  ;;  %v122_v1 = vld [vmem:[%s4746_s0 + $0x338] sm:$0xff] }
  0xa5   :  { %3153 = vmatprep.mubr.msk.bf16.mxu1 %vm751_vm0, %v263_v2  ;;  %v129_v2 = vld [vmem:[%s4746_s0 + $0x370] sm:$0xff] }
  0xa6   :  { %v297_v6 = vpack.c.bf16 %v129_v2, %v122_v1  ;;  %v206_v2 = vld [vmem:[%s4746_s0 + $0x5d8] sm:$0xff] }
  0xaa   :  { %1163 = vmatmul.mubr.bf16.gmra.mrb[68].mxu0 %v254_v7  ;;  %v221_v7 = vld [vmem:[%s4746_s0 + $0x650] sm:$0xff] }
  0xab   :  { %1170 = vmatprep.mubr.bf16.mxu0 %v262_v10  ;;  %v347_v10 = vpack.c.bf16 %v228_v8, %v221_v7 }
  0xac   :  { %3154 = vmatmul.mubr.msk.bf16.gmra.mrb[68].mxu1 %vm751_vm0, %v270_v13  ;;  %v136_v13 = vld [vmem:[%s4746_s0 + $0x3a8] sm:$0xff] }
  0xad   :  { %3157 = vmatprep.mubr.msk.bf16.mxu1 %vm751_vm0, %v277_v14  ;;  %v143_v14 = vld [vmem:[%s4746_s0 + $0x3e0] sm:$0xff] }
  0xae   :  { %v304_v18 = vpack.c.bf16 %v143_v14, %v136_v13 }
  0xb2   :  { %1171 = vmatmul.mubr.bf16.gmra.mrb[72].mxu0 %v261_v19  ;;  %v354_v19 = vpack.c.bf16 %v242_v17, %v235_v16  ;;  %v3379_v16 = vld [vmem:[%s4747_s2 + $0x28] sm:$0xff]  }
  0xb3   :  { %1178 = vmatprep.mubr.bf16.mxu0 %v269_v22  ;;  %v150_v22 = vld [vmem:[%s4746_s0 + $0x418] sm:$0xff] }
  0xb4   :  { %3158 = vmatmul.mubr.msk.bf16.gmra.mrb[72].mxu1 %vm751_vm0, %v284_v25  ;;  %v311_v25 = vpack.c.bf16 %v157_v23, %v150_v22 }
  0xb5   :  { %3161 = vmatprep.mubr.msk.bf16.mxu1 %vm751_vm0, %v291_v26  ;;  %v149_v26 = vld [vmem:[%s4746_s0 + $0x410] sm:$0xff] }
  0xb6   :  { %v310_v30 = vpack.c.bf16 %v156_v27, %v149_v26  ;;  %v205_v26 = vld [vmem:[%s4746_s0 + $0x5d0] sm:$0xff]  ;;  %v212_v27 = vld [vmem:[%s4746_s0 + $0x608] sm:$0xff] }
  0xb7   :  { %v338_v36 = vpack.c.bf16 %v212_v27, %v205_v26 }
  0xba   :  { %1179 = vmatmul.mubr.bf16.gmra.mrb[76].mxu0 %v268_v31  ;;  %v318_v31 = vpack.c.bf16 %v171_v29, %v164_v28  ;;  %v3380_v28 = vld [vmem:[%s4747_s2 + $0x30] sm:$0xff]  }
  0xbb   :  { %1186 = vmatprep.mubr.bf16.mxu0 %v276_v34  ;;  %v170_v34 = vld [vmem:[%s4746_s0 + $0x4b8] sm:$0xff] }
  0xbc   :  { %3162 = vmatmul.mubr.msk.bf16.gmra.mrb[76].mxu1 %vm751_vm0, %v298_v37  ;;  %v4205_v37 = vshrl.u32 %v453_v32, 7  ;;  %v317_v39 = vpack.c.bf16 %v170_v34, %v163_v33  ;;  %v227_v32 = vld [vmem:[%s4746_s0 + $0x680] sm:$0xff] }
  0xbd   :  { %3165 = vmatprep.mubr.msk.bf16.mxu1 %vm751_vm0, %v305_v38  ;;  %v3374_v38 = vld [vmem:[%s4747_s2] sm:$0xff]  }
  0xbe   :  { %3181 = vmatprep.subr.bf16.mxu1 %v3374_v38  ;;  %v455_v40 = vsub.s32 0, %v4205_v37 }
  0xbf   :  { %3182 = vmatpush3.bf16.msra.mxu1 %v3374_v38 }
  0xc0   :  { %3183 = vmatprep.subr.bf16.mxu1 %v3375_v42 }
  0xc2   :  { %1187 = vmatmul.mubr.bf16.gmra.mrb[80].mxu0 %v275_v43  ;;  %v18_v43 = vld [vmem:[%s4748_s3] sm:$0xf] }
  0xc3   :  { %1194 = vmatprep.mubr.bf16.mxu0 %v283_v46  ;;  %v192_v46 = vld [vmem:[%s4746_s0 + $0x568] sm:$0xff]  ;;  %3184 = vmatpush3.bf16.msra.mxu1 %v3375_v42 }
  0xc4   :  { %3166 = vmatmul.mubr.msk.bf16.gmra.mrb[80].mxu1 %vm751_vm0, %v312_v49  ;;  %3185 = vmatprep.subr.bf16.mxu1 %v3376_v48 }
  0xc5   :  { %3169 = vmatprep.mubr.msk.bf16.mxu1 %vm751_vm0, %v319_v50  ;;  %v4232_v50 = vrot.slane %v18_v43, %v455_v40 }
  0xc7   :  { %3186 = vmatpush3.bf16.msra.mxu1 %v3376_v48 }
  0xc8   :  { %3187 = vmatprep.subr.bf16.mxu1 %v3377_v56 }
  0xca   :  { %1195 = vmatmul.mubr.bf16.gmra.mrb[84].mxu0 %v282_v55  ;;  %v332_v55 = vpack.c.bf16 %v199_v47, %v192_v46 }
  0xcb   :  { %1202 = vmatprep.mubr.bf16.mxu0 %v290_v58  ;;  %3188 = vmatpush3.bf16.msra.mxu1 %v3377_v56  ;;  %v234_v56 = vld [vmem:[%s4746_s0 + $0x6b8] sm:$0xff] }
  0xcc   :  { %3170 = vmatmul.mubr.msk.bf16.gmra.mrb[84].mxu1 %vm751_vm0, %v326_v61 }
  0xcd   :  { %3173 = vmatprep.mubr.msk.bf16.mxu1 %vm751_vm0, %v333_v62  ;;  %v191_v62 = vld [vmem:[%s4746_s0 + $0x560] sm:$0xff] }
  0xce   :  { %v331_v12 = vpack.c.bf16 %v198_v63, %v191_v62 }
  0xd2   :  { %1203 = vmatmul.mubr.bf16.gmra.mrb[88].mxu0 %v289_v3  ;;  %v213_v3 = vld [vmem:[%s4746_s0 + $0x610] sm:$0xff] }
  0xd3   :  { %1210 = vmatprep.mubr.bf16.mxu0 %v297_v6  ;;  %v3378_v6 = vld [vmem:[%s4747_s2 + $0x20] sm:$0xff]  }
  0xd4   :  { %3174 = vmatmul.mubr.msk.bf16.gmra.mrb[88].mxu1 %vm751_vm0, %v340_v9  ;;  %3189 = vmatprep.subr.bf16.mxu1 %v3378_v6 }
  0xd5   :  { %3177 = vmatprep.mubr.msk.bf16.mxu1 %vm751_vm0, %v347_v10  ;;  %3190 = vmatpush3.bf16.msra.mxu1 %v3378_v6 }
  0xd6   :  { %3191 = vmatprep.subr.bf16.mxu1 %v3379_v16 }
  0xd9   :  { %3192 = vmatpush3.bf16.msra.mxu1 %v3379_v16 }
  0xda   :  { %1211 = vmatmul.mubr.bf16.gmra.mrb[92].mxu0 %v296_v15  ;;  %v339_v15 = vpack.c.bf16 %v213_v3, %v206_v2  ;;  %3193 = vmatprep.subr.bf16.mxu1 %v3380_v28 }
  0xdb   :  { %1218 = vmatprep.mubr.bf16.mxu0 %v304_v18 }
  0xdc   :  { %3178 = vmatmul.mubr.msk.bf16.gmra.mrb[92].mxu1 %vm751_vm0, %v354_v19 }
  0xdd   :  { %3194 = vmatpush3.bf16.msra.mxu1 %v3380_v28 }
  0xe2   :  { %1219 = vmatmul.mubr.bf16.gmra.mrb[96].mxu0 %v303_v24 }
  0xe3   :  { %1226 = vmatprep.mubr.bf16.mxu0 %v311_v25 }
  0xea   :  { %1227 = vmatmul.mubr.bf16.gmra.mrb[100].mxu0 %v310_v30 }
  0xeb   :  { %1234 = vmatprep.mubr.bf16.mxu0 %v318_v31  ;;  %v220_v31 = vld [vmem:[%s4746_s0 + $0x648] sm:$0xff] }
  0xec   :  { %v346_v40 = vpack.c.bf16 %v227_v32, %v220_v31 }
  0xf2   :  { %1235 = vmatmul.mubr.bf16.gmra.mrb[104].mxu0 %v317_v39 }
  0xf3   :  { %1242 = vmatprep.mubr.bf16.mxu0 %v325_v41  ;;  %v3381_v41 = vld [vmem:[%s4747_s2 + $0x38] sm:$0xff]  }
  0xf4   :  { %3195 = vmatprep.subr.bf16.mxu1 %v3381_v41 }
  0xf5   :  { %v2738_v49 = vpop.f32.mrb[0].mxu0  ;;  %3196 = vmatpush3.bf16.msra.mxu1 %v3381_v41 }
  0xf6   :  { %v2739_v51 = vpop.f32.mrb[1].mxu0 }
  0xf7   :  { %v2740_v53 = vadd.f32 %v2739_v51, %v2738_v49  ;;  %v2741_v54 = vpop.f32.mrb[2].mxu0  ;;  %v2850_v57 = vpop.f32.mrb[0].mxu1 }
  0xf8   :  { %v2742_v58 = vpop.f32.mrb[3].mxu0  ;;  %v2851_v61 = vpop.f32.mrb[1].mxu1 }
  0xf9   :  { %v835_v59 = vadd.f32 %v2740_v53, %v4232_v50  ;;  %v2743_v60 = vadd.f32 %v2742_v58, %v2741_v54  ;;  %v2852_v0 = vadd.f32 %v2851_v61, %v2850_v57  ;;  %v2853_v1 = vpop.f32.mrb[2].mxu1  ;;  %v226_v53 = vld [vmem:[%s4746_s0 + $0x678] sm:$0xff]  ;;  %v241_v57 = vld [vmem:[%s4746_s0 + $0x6f0] sm:$0xff] }
  0xfa   :  { %1243 = vmatmul.mubr.bf16.gmra.mrb[108].mxu0 %v324_v52  ;;  %v2854_v5 = vpop.f32.mrb[3].mxu1  ;;  %v219_v52 = vld [vmem:[%s4746_s0 + $0x640] sm:$0xff] }
  0xfb   :  { %v838_v4 = vadd.f32 %v2743_v60, %v4232_v50  ;;  %1250 = vmatprep.mubr.bf16.mxu0 %v332_v55  ;;  %v4254_v7 = vadd.f32 %v2852_v0, %v835_v59  ;;  %v2855_v8 = vadd.f32 %v2854_v5, %v2853_v1  ;;  %v345_v61 = vpack.c.bf16 %v226_v53, %v219_v52 }
  0xfc   :  { %v353_v0 = vpack.c.bf16 %v241_v57, %v234_v56 }
  0xfd   :  { %v2744_v9 = vpop.f32.mrb[4].mxu0  ;;  %v4256_v10 = vadd.f32 %v2855_v8, %v838_v4 }
  0xfe   :  { %v2745_v11 = vpop.f32.mrb[5].mxu0 }
  0xff   :  { %v2746_v13 = vadd.f32 %v2745_v11, %v2744_v9  ;;  %v2747_v14 = vpop.f32.mrb[6].mxu0  ;;  %v2856_v17 = vpop.f32.mrb[4].mxu1 }
 0x100   :  { %v2748_v18 = vpop.f32.mrb[7].mxu0  ;;  %v2857_v21 = vpop.f32.mrb[5].mxu1 }
 0x101   :  { %v843_v19 = vadd.f32 %v2746_v13, %v4232_v50  ;;  %v2749_v20 = vadd.f32 %v2748_v18, %v2747_v14  ;;  %v2858_v22 = vadd.f32 %v2857_v21, %v2856_v17  ;;  %v2859_v23 = vpop.f32.mrb[6].mxu1  ;;  %v240_v13 = vld [vmem:[%s4746_s0 + $0x6e8] sm:$0xff] }
 0x102   :  { %1251 = vmatmul.mubr.bf16.gmra.mrb[112].mxu0 %v331_v12  ;;  %v2860_v25 = vpop.f32.mrb[7].mxu1  ;;  %v233_v12 = vld [vmem:[%s4746_s0 + $0x6b0] sm:$0xff] }
 0x103   :  { %v846_v24 = vadd.f32 %v2749_v20, %v4232_v50  ;;  %1258 = vmatprep.mubr.bf16.mxu0 %v339_v15  ;;  %v4272_v29 = vadd.f32 %v2858_v22, %v843_v19  ;;  %v2861_v30 = vadd.f32 %v2860_v25, %v2859_v23  ;;  %v352_v19 = vpack.c.bf16 %v240_v13, %v233_v12 }
 0x105   :  { %v2750_v33 = vpop.f32.mrb[8].mxu0  ;;  %v4280_v34 = vadd.f32 %v2861_v30, %v846_v24 }
 0x106   :  { %v2751_v35 = vpop.f32.mrb[9].mxu0 }
 0x107   :  { %v2752_v38 = vadd.f32 %v2751_v35, %v2750_v33  ;;  %v2753_v39 = vpop.f32.mrb[10].mxu0  ;;  %v2862_v42 = vpop.f32.mrb[8].mxu1 }
 0x108   :  { %v2754_v43 = vpop.f32.mrb[11].mxu0  ;;  %v2863_v46 = vpop.f32.mrb[9].mxu1 }
 0x109   :  { %v851_v44 = vadd.f32 %v2752_v38, %v4232_v50  ;;  %v2755_v45 = vadd.f32 %v2754_v43, %v2753_v39  ;;  %v2864_v47 = vadd.f32 %v2863_v46, %v2862_v42  ;;  %v2865_v48 = vpop.f32.mrb[10].mxu1 }
 0x10a   :  { %1259 = vmatmul.mubr.bf16.gmra.mrb[116].mxu0 %v338_v36  ;;  %v2866_v51 = vpop.f32.mrb[11].mxu1 }
 0x10b   :  { %v854_v49 = vadd.f32 %v2755_v45, %v4232_v50  ;;  %1266 = vmatprep.mubr.bf16.mxu0 %v346_v40  ;;  %v4293_v54 = vadd.f32 %v2864_v47, %v851_v44  ;;  %v2867_v55 = vadd.f32 %v2866_v51, %v2865_v48 }
 0x10d   :  { %v2756_v58 = vpop.f32.mrb[12].mxu0  ;;  %v4301_v59 = vadd.f32 %v2867_v55, %v854_v49 }
 0x10e   :  { %v2757_v60 = vpop.f32.mrb[13].mxu0 }
 0x10f   :  { %v2758_v62 = vadd.f32 %v2757_v60, %v2756_v58  ;;  %v2759_v63 = vpop.f32.mrb[14].mxu0  ;;  %v2868_v1 = vpop.f32.mrb[12].mxu1 }
 0x110   :  { %v2760_v2 = vpop.f32.mrb[15].mxu0  ;;  %v2869_v5 = vpop.f32.mrb[13].mxu1 }
 0x111   :  { %v859_v3 = vadd.f32 %v2758_v62, %v4232_v50  ;;  %v2761_v4 = vadd.f32 %v2760_v2, %v2759_v63  ;;  %v2870_v6 = vadd.f32 %v2869_v5, %v2868_v1  ;;  %v2871_v8 = vpop.f32.mrb[14].mxu1 }
 0x112   :  { %1267 = vmatmul.mubr.bf16.gmra.mrb[120].mxu0 %v345_v61  ;;  %v2872_v11 = vpop.f32.mrb[15].mxu1 }
 0x113   :  { %v862_v9 = vadd.f32 %v2761_v4, %v4232_v50  ;;  %1274 = vmatprep.mubr.bf16.mxu0 %v353_v0  ;;  %v4311_v14 = vadd.f32 %v2870_v6, %v859_v3  ;;  %v2873_v15 = vadd.f32 %v2872_v11, %v2871_v8 }
 0x115   :  { %v2762_v16 = vpop.f32.mrb[16].mxu0  ;;  %v4313_v17 = vadd.f32 %v2873_v15, %v862_v9 }
 0x116   :  { %v2763_v18 = vpop.f32.mrb[17].mxu0 }
 0x117   :  { %v2764_v20 = vadd.f32 %v2763_v18, %v2762_v16  ;;  %v2765_v21 = vpop.f32.mrb[18].mxu0  ;;  %v2874_v22 = vpop.f32.mrb[16].mxu1 }
 0x118   :  { %v2766_v23 = vpop.f32.mrb[19].mxu0  ;;  %v2875_v26 = vpop.f32.mrb[17].mxu1 }
 0x119   :  { %v867_v24 = vadd.f32 %v2764_v20, %v4232_v50  ;;  %v2767_v25 = vadd.f32 %v2766_v23, %v2765_v21  ;;  %v2876_v27 = vadd.f32 %v2875_v26, %v2874_v22  ;;  %v2877_v28 = vpop.f32.mrb[18].mxu1 }
 0x11a   :  { %1275 = vmatmul.mubr.bf16.gmra.mrb[124].mxu0 %v352_v19  ;;  %v2878_v31 = vpop.f32.mrb[19].mxu1 }
 0x11b   :  { %v870_v30 = vadd.f32 %v2767_v25, %v4232_v50  ;;  %v4317_v32 = vadd.f32 %v2876_v27, %v867_v24  ;;  %v2879_v33 = vadd.f32 %v2878_v31, %v2877_v28 }
 0x11d   :  { %v2768_v35 = vpop.f32.mrb[20].mxu0  ;;  %v4319_v36 = vadd.f32 %v2879_v33, %v870_v30 }
 0x11e   :  { %v2769_v38 = vpop.f32.mrb[21].mxu0 }
 0x11f   :  { %v2770_v39 = vadd.f32 %v2769_v38, %v2768_v35  ;;  %v2771_v40 = vpop.f32.mrb[22].mxu0  ;;  %v2880_v41 = vpop.f32.mrb[20].mxu1 }
 0x120   :  { %v2772_v42 = vpop.f32.mrb[23].mxu0  ;;  %v2881_v45 = vpop.f32.mrb[21].mxu1 }
 0x121   :  { %v875_v43 = vadd.f32 %v2770_v39, %v4232_v50  ;;  %v2773_v44 = vadd.f32 %v2772_v42, %v2771_v40  ;;  %v2882_v46 = vadd.f32 %v2881_v45, %v2880_v41  ;;  %v2883_v47 = vpop.f32.mrb[22].mxu1 }
 0x122   :  { %v2884_v49 = vpop.f32.mrb[23].mxu1 }
 0x123   :  { %v878_v48 = vadd.f32 %v2773_v44, %v4232_v50  ;;  %v4323_v51 = vadd.f32 %v2882_v46, %v875_v43  ;;  %v2885_v52 = vadd.f32 %v2884_v49, %v2883_v47 }
 0x125   :  { %v2774_v53 = vpop.f32.mrb[24].mxu0  ;;  %v4325_v55 = vadd.f32 %v2885_v52, %v878_v48 }
 0x126   :  { %v2775_v56 = vpop.f32.mrb[25].mxu0 }
 0x127   :  { %v2776_v57 = vadd.f32 %v2775_v56, %v2774_v53  ;;  %v2777_v58 = vpop.f32.mrb[26].mxu0  ;;  %v2886_v60 = vpop.f32.mrb[24].mxu1 }
 0x128   :  { %v2778_v61 = vpop.f32.mrb[27].mxu0  ;;  %v2887_v0 = vpop.f32.mrb[25].mxu1 }
 0x129   :  { %v883_v62 = vadd.f32 %v2776_v57, %v4232_v50  ;;  %v2779_v63 = vadd.f32 %v2778_v61, %v2777_v58  ;;  %v2888_v1 = vadd.f32 %v2887_v0, %v2886_v60  ;;  %v2889_v2 = vpop.f32.mrb[26].mxu1 }
 0x12a   :  { %v2890_v4 = vpop.f32.mrb[27].mxu1 }
 0x12b   :  { %v886_v3 = vadd.f32 %v2779_v63, %v4232_v50  ;;  %v4329_v5 = vadd.f32 %v2888_v1, %v883_v62  ;;  %v2891_v6 = vadd.f32 %v2890_v4, %v2889_v2 }
 0x12d   :  { %v2780_v8 = vpop.f32.mrb[28].mxu0  ;;  %v4331_v9 = vadd.f32 %v2891_v6, %v886_v3 }
 0x12e   :  { %v2781_v11 = vpop.f32.mrb[29].mxu0 }
 0x12f   :  { %v2782_v12 = vadd.f32 %v2781_v11, %v2780_v8  ;;  %v2783_v13 = vpop.f32.mrb[30].mxu0  ;;  %v2892_v15 = vpop.f32.mrb[28].mxu1 }
 0x130   :  { %v2784_v16 = vpop.f32.mrb[31].mxu0  ;;  %v2893_v20 = vpop.f32.mrb[29].mxu1 }
 0x131   :  { %v891_v18 = vadd.f32 %v2782_v12, %v4232_v50  ;;  %v2785_v19 = vadd.f32 %v2784_v16, %v2783_v13  ;;  %v2894_v21 = vadd.f32 %v2893_v20, %v2892_v15  ;;  %v2895_v22 = vpop.f32.mrb[30].mxu1 }
 0x132   :  { %v2896_v24 = vpop.f32.mrb[31].mxu1 }
 0x133   :  { %v894_v23 = vadd.f32 %v2785_v19, %v4232_v50  ;;  %v4335_v25 = vadd.f32 %v2894_v21, %v891_v18  ;;  %v2897_v26 = vadd.f32 %v2896_v24, %v2895_v22 }
 0x135   :  { %v2786_v27 = vpop.f32.mrb[32].mxu0  ;;  %v4337_v28 = vadd.f32 %v2897_v26, %v894_v23 }
 0x136   :  { %v2787_v30 = vpop.f32.mrb[33].mxu0 }
 0x137   :  { %v2788_v31 = vadd.f32 %v2787_v30, %v2786_v27  ;;  %v2789_v33 = vpop.f32.mrb[34].mxu0  ;;  %v2898_v35 = vpop.f32.mrb[32].mxu1 }
 0x138   :  { %v2790_v38 = vpop.f32.mrb[35].mxu0  ;;  %v2899_v41 = vpop.f32.mrb[33].mxu1 }
 0x139   :  { %v899_v39 = vadd.f32 %v2788_v31, %v4232_v50  ;;  %v2791_v40 = vadd.f32 %v2790_v38, %v2789_v33  ;;  %v2900_v42 = vadd.f32 %v2899_v41, %v2898_v35  ;;  %v2901_v43 = vpop.f32.mrb[34].mxu1 }
 0x13a   :  { %v2902_v45 = vpop.f32.mrb[35].mxu1 }
 0x13b   :  { %v902_v44 = vadd.f32 %v2791_v40, %v4232_v50  ;;  %v4341_v46 = vadd.f32 %v2900_v42, %v899_v39  ;;  %v2903_v47 = vadd.f32 %v2902_v45, %v2901_v43 }
 0x13d   :  { %v2792_v48 = vpop.f32.mrb[36].mxu0  ;;  %v4343_v49 = vadd.f32 %v2903_v47, %v902_v44 }
 0x13e   :  { %v2793_v52 = vpop.f32.mrb[37].mxu0 }
 0x13f   :  { %v2794_v53 = vadd.f32 %v2793_v52, %v2792_v48  ;;  %v2795_v56 = vpop.f32.mrb[38].mxu0  ;;  %v2904_v57 = vpop.f32.mrb[36].mxu1 }
 0x140   :  { %v2796_v58 = vpop.f32.mrb[39].mxu0  ;;  %v2905_v62 = vpop.f32.mrb[37].mxu1 }
 0x141   :  { %v907_v60 = vadd.f32 %v2794_v53, %v4232_v50  ;;  %v2797_v61 = vadd.f32 %v2796_v58, %v2795_v56  ;;  %v2906_v63 = vadd.f32 %v2905_v62, %v2904_v57  ;;  %v2907_v0 = vpop.f32.mrb[38].mxu1 }
 0x142   :  { %v2908_v2 = vpop.f32.mrb[39].mxu1 }
 0x143   :  { %v910_v1 = vadd.f32 %v2797_v61, %v4232_v50  ;;  %v4347_v3 = vadd.f32 %v2906_v63, %v907_v60  ;;  %v2909_v4 = vadd.f32 %v2908_v2, %v2907_v0 }
 0x145   :  { %v2798_v6 = vpop.f32.mrb[40].mxu0  ;;  %v4349_v8 = vadd.f32 %v2909_v4, %v910_v1 }
 0x146   :  { %v2799_v11 = vpop.f32.mrb[41].mxu0 }
 0x147   :  { %v2800_v12 = vadd.f32 %v2799_v11, %v2798_v6  ;;  %v2801_v13 = vpop.f32.mrb[42].mxu0  ;;  %v2910_v15 = vpop.f32.mrb[40].mxu1 }
 0x148   :  { %v2802_v16 = vpop.f32.mrb[43].mxu0  ;;  %v2911_v20 = vpop.f32.mrb[41].mxu1 }
 0x149   :  { %v915_v18 = vadd.f32 %v2800_v12, %v4232_v50  ;;  %v2803_v19 = vadd.f32 %v2802_v16, %v2801_v13  ;;  %v2912_v21 = vadd.f32 %v2911_v20, %v2910_v15  ;;  %v2913_v22 = vpop.f32.mrb[42].mxu1 }
 0x14a   :  { %v2914_v24 = vpop.f32.mrb[43].mxu1 }
 0x14b   :  { %v918_v23 = vadd.f32 %v2803_v19, %v4232_v50  ;;  %v4353_v26 = vadd.f32 %v2912_v21, %v915_v18  ;;  %v2915_v27 = vadd.f32 %v2914_v24, %v2913_v22 }
 0x14d   :  { %v2804_v30 = vpop.f32.mrb[44].mxu0  ;;  %v4355_v31 = vadd.f32 %v2915_v27, %v918_v23 }
 0x14e   :  { %v2805_v33 = vpop.f32.mrb[45].mxu0 }
 0x14f   :  { %v2806_v35 = vadd.f32 %v2805_v33, %v2804_v30  ;;  %v2807_v38 = vpop.f32.mrb[46].mxu0  ;;  %v2916_v39 = vpop.f32.mrb[44].mxu1 }
 0x150   :  { %v2808_v40 = vpop.f32.mrb[47].mxu0  ;;  %v2917_v43 = vpop.f32.mrb[45].mxu1 }
 0x151   :  { %v923_v41 = vadd.f32 %v2806_v35, %v4232_v50  ;;  %v2809_v42 = vadd.f32 %v2808_v40, %v2807_v38  ;;  %v2918_v44 = vadd.f32 %v2917_v43, %v2916_v39  ;;  %v2919_v45 = vpop.f32.mrb[46].mxu1 }
 0x152   :  { %v2920_v48 = vpop.f32.mrb[47].mxu1 }
 0x153   :  { %v926_v47 = vadd.f32 %v2809_v42, %v4232_v50  ;;  %v4359_v52 = vadd.f32 %v2918_v44, %v923_v41  ;;  %v2921_v53 = vadd.f32 %v2920_v48, %v2919_v45 }
 0x155   :  { %v2810_v56 = vpop.f32.mrb[48].mxu0  ;;  %v4361_v57 = vadd.f32 %v2921_v53, %v926_v47 }
 0x156   :  { %v2811_v58 = vpop.f32.mrb[49].mxu0 }
 0x157   :  { %v2812_v60 = vadd.f32 %v2811_v58, %v2810_v56  ;;  %v2813_v61 = vpop.f32.mrb[50].mxu0  ;;  %v2922_v62 = vpop.f32.mrb[48].mxu1 }
 0x158   :  { %v2814_v63 = vpop.f32.mrb[51].mxu0  ;;  %v2923_v2 = vpop.f32.mrb[49].mxu1 }
 0x159   :  { %v931_v0 = vadd.f32 %v2812_v60, %v4232_v50  ;;  %v2815_v1 = vadd.f32 %v2814_v63, %v2813_v61  ;;  %v2924_v4 = vadd.f32 %v2923_v2, %v2922_v62  ;;  %v2925_v6 = vpop.f32.mrb[50].mxu1 }
 0x15a   :  { %v2926_v12 = vpop.f32.mrb[51].mxu1 }
 0x15b   :  { %v934_v11 = vadd.f32 %v2815_v1, %v4232_v50  ;;  %v4365_v13 = vadd.f32 %v2924_v4, %v931_v0  ;;  %v2927_v15 = vadd.f32 %v2926_v12, %v2925_v6 }
 0x15d   :  { %v2816_v16 = vpop.f32.mrb[52].mxu0  ;;  %v4367_v18 = vadd.f32 %v2927_v15, %v934_v11 }
 0x15e   :  { %v2817_v19 = vpop.f32.mrb[53].mxu0 }
 0x15f   :  { %v2818_v20 = vadd.f32 %v2817_v19, %v2816_v16  ;;  %v2819_v21 = vpop.f32.mrb[54].mxu0  ;;  %v2928_v22 = vpop.f32.mrb[52].mxu1 }
 0x160   :  { %v2820_v23 = vpop.f32.mrb[55].mxu0  ;;  %v2929_v30 = vpop.f32.mrb[53].mxu1 }
 0x161   :  { %v939_v24 = vadd.f32 %v2818_v20, %v4232_v50  ;;  %v2821_v27 = vadd.f32 %v2820_v23, %v2819_v21  ;;  %v2930_v33 = vadd.f32 %v2929_v30, %v2928_v22  ;;  %v2931_v35 = vpop.f32.mrb[54].mxu1 }
 0x162   :  { %v2932_v39 = vpop.f32.mrb[55].mxu1 }
 0x163   :  { %v942_v38 = vadd.f32 %v2821_v27, %v4232_v50  ;;  %v4371_v40 = vadd.f32 %v2930_v33, %v939_v24  ;;  %v2933_v41 = vadd.f32 %v2932_v39, %v2931_v35 }
 0x165   :  { %v2822_v42 = vpop.f32.mrb[56].mxu0  ;;  %v4373_v43 = vadd.f32 %v2933_v41, %v942_v38 }
 0x166   :  { %v2823_v44 = vpop.f32.mrb[57].mxu0 }
 0x167   :  { %v2824_v45 = vadd.f32 %v2823_v44, %v2822_v42  ;;  %v2825_v47 = vpop.f32.mrb[58].mxu0  ;;  %v2934_v48 = vpop.f32.mrb[56].mxu1 }
 0x168   :  { %v2826_v53 = vpop.f32.mrb[59].mxu0  ;;  %v2935_v60 = vpop.f32.mrb[57].mxu1 }
 0x169   :  { %v947_v56 = vadd.f32 %v2824_v45, %v4232_v50  ;;  %v2827_v58 = vadd.f32 %v2826_v53, %v2825_v47  ;;  %v2936_v61 = vadd.f32 %v2935_v60, %v2934_v48  ;;  %v2937_v62 = vpop.f32.mrb[58].mxu1 }
 0x16a   :  { %v2938_v0 = vpop.f32.mrb[59].mxu1 }
 0x16b   :  { %v950_v63 = vadd.f32 %v2827_v58, %v4232_v50  ;;  %v4377_v1 = vadd.f32 %v2936_v61, %v947_v56  ;;  %v2939_v2 = vadd.f32 %v2938_v0, %v2937_v62  ;;  %v3382_v62 = vld [vmem:[%s4747_s2 + $0x40] sm:$0xff]  }
 0x16c   :  { %3229 = vmatprep.subr.bf16.mxu0 %v3382_v62 }
 0x16d   :  { %v2828_v4 = vpop.f32.mrb[60].mxu0  ;;  %v4379_v6 = vadd.f32 %v2939_v2, %v950_v63  ;;  %v3383_v63 = vld [vmem:[%s4747_s2 + $0x48] sm:$0xff]   ;;  %3230 = vmatpush3.bf16.msra.mxu0 %v3382_v62 }
 0x16e   :  { %v2829_v11 = vpop.f32.mrb[61].mxu0  ;;  %3231 = vmatprep.subr.bf16.mxu0 %v3383_v63 }
 0x16f   :  { %v2830_v12 = vadd.f32 %v2829_v11, %v2828_v4  ;;  %v2831_v15 = vpop.f32.mrb[62].mxu0  ;;  %v2940_v16 = vpop.f32.mrb[60].mxu1 }
 0x170   :  { %v2832_v19 = vpop.f32.mrb[63].mxu0  ;;  %v2941_v22 = vpop.f32.mrb[61].mxu1 }
 0x171   :  { %v955_v20 = vadd.f32 %v2830_v12, %v4232_v50  ;;  %v2833_v21 = vadd.f32 %v2832_v19, %v2831_v15  ;;  %v2942_v23 = vadd.f32 %v2941_v22, %v2940_v16  ;;  %v2943_v24 = vpop.f32.mrb[62].mxu1  ;;  %v3384_v19 = vld [vmem:[%s4747_s2 + $0x50] sm:$0xff]   ;;  %3232 = vmatpush3.bf16.msra.mxu0 %v3383_v63 }
 0x172   :  { %v2944_v30 = vpop.f32.mrb[63].mxu1  ;;  %3233 = vmatprep.subr.bf16.mxu0 %v3384_v19 }
 0x173   :  { %v958_v27 = vadd.f32 %v2833_v21, %v4232_v50  ;;  %v4383_v33 = vadd.f32 %v2942_v23, %v955_v20  ;;  %v2945_v35 = vadd.f32 %v2944_v30, %v2943_v24 }
 0x175   :  { %v2962_v38 = vpop.f32.mrb[64].mxu0  ;;  %v4385_v39 = vadd.f32 %v2945_v35, %v958_v27  ;;  %3234 = vmatpush3.bf16.msra.mxu0 %v3384_v19 }
 0x176   :  { %v2963_v41 = vpop.f32.mrb[65].mxu0 }
 0x177   :  { %v2964_v42 = vadd.f32 %v2963_v41, %v2962_v38  ;;  %v2965_v44 = vpop.f32.mrb[66].mxu0  ;;  %v3151_v47 = vpop.f32.mrb[64].mxu1 }
 0x178   :  { %v2966_v45 = vpop.f32.mrb[67].mxu0  ;;  %v1317_v56 = vpop.f32.mrb[65].mxu1 }
 0x179   :  { %v2967_v48 = vadd.f32 %v2966_v45, %v2965_v44  ;;  %v1157_v53 = vadd.f32 %v2964_v42, %v4254_v7  ;;  %v3152_v58 = vpop.f32.mrb[66].mxu1  ;;  %v3385_v42 = vld [vmem:[%s4747_s2 + $0x58] sm:$0xff]  }
 0x17a   :  { %v1320_v61 = vpop.f32.mrb[67].mxu1  ;;  %3235 = vmatprep.subr.bf16.mxu0 %v3385_v42 }
 0x17b   :  { %v1318_v60 = vadd.f32 %v1317_v56, %v1157_v53  ;;  %v1160_v50 = vadd.f32 %v2967_v48, %v4256_v10  ;;  %3236 = vmatpush3.bf16.msra.mxu0 %v3385_v42 }
 0x17d   :  { %v1476_v0 = vmul.f32 0.01, %v1318_v60  ;;  %v1321_v2 = vadd.f32 %v1320_v61, %v1160_v50  ;;  %v2968_v4 = vpop.f32.mrb[68].mxu0  ;;  %vm1444_vm1 = vcmp.gt.f32.partialorder %v1318_v60, 0.0  ;;  %v3386_v50 = vld [vmem:[%s4747_s2 + $0x60] sm:$0xff]  }
 0x17e   :  { %v2969_v11 = vpop.f32.mrb[69].mxu0  ;;  %3237 = vmatprep.subr.bf16.mxu0 %v3386_v50 }
 0x17f   :  { %vm1445_vm2 = vcmp.gt.f32.partialorder %v1321_v2, 0.0  ;;  %v1477_v7 = vmul.f32 0.01, %v1321_v2  ;;  %v2970_v12 = vadd.f32 %v2969_v11, %v2968_v4  ;;  %v2971_v15 = vpop.f32.mrb[70].mxu0  ;;  %v4395_v16 = vpop.f32.mrb[68].mxu1  ;;  %v1508_v22 = vsel %vm1444_vm1, %v1318_v60, %v1476_v0  ;;  %3238 = vmatpush3.bf16.msra.mxu0 %v3386_v50 }
 0x180   :  { %v2972_v10 = vpop.f32.mrb[71].mxu0  ;;  %v1333_v24 = vpop.f32.mrb[69].mxu1 }
 0x181   :  { %v1165_v20 = vadd.f32 %v2970_v12, %v4272_v29  ;;  %v2973_v21 = vadd.f32 %v2972_v10, %v2971_v15  ;;  %v1509_v23 = vsel %vm1445_vm2, %v1321_v2, %v1477_v7  ;;  %v3156_v30 = vpop.f32.mrb[70].mxu1 }
 0x182   :  { %v1540_v27 = vpack.c.bf16 %v1509_v23, %v1508_v22  ;;  %v1336_v41 = vpop.f32.mrb[71].mxu1 }
 0x183   :  { %v1326_v35 = vadd.f32 %v3151_v47, %v1165_v20  ;;  %v1168_v38 = vadd.f32 %v2973_v21, %v4280_v34 }
 0x184   :  { %3197 = vmatprep.mubr.bf16.mxu1 %v1540_v27 }
 0x185   :  { %v1478_v44 = vmul.f32 0.01, %v1326_v35  ;;  %v1329_v45 = vadd.f32 %v3152_v58, %v1168_v38  ;;  %v2974_v29 = vpop.f32.mrb[72].mxu0  ;;  %vm1446_vm3 = vcmp.gt.f32.partialorder %v1326_v35, 0.0 }
 0x186   :  { %v2975_v48 = vpop.f32.mrb[73].mxu0 }
 0x187   :  { %vm1447_vm4 = vcmp.gt.f32.partialorder %v1329_v45, 0.0  ;;  %v1479_v53 = vmul.f32 0.01, %v1329_v45  ;;  %v2976_v56 = vadd.f32 %v2975_v48, %v2974_v29  ;;  %v2977_v60 = vpop.f32.mrb[74].mxu0  ;;  %v4405_v34 = vpop.f32.mrb[72].mxu1  ;;  %v1510_v61 = vsel %vm1446_vm3, %v1326_v35, %v1478_v44 }
 0x188   :  { %v2978_v47 = vpop.f32.mrb[75].mxu0  ;;  %v1349_v0 = vpop.f32.mrb[73].mxu1 }
 0x189   :  { %v1511_v62 = vsel %vm1447_vm4, %v1329_v45, %v1479_v53  ;;  %v2979_v63 = vadd.f32 %v2978_v47, %v2977_v60  ;;  %v1173_v58 = vadd.f32 %v2976_v56, %v4293_v54  ;;  %v4411_v4 = vpop.f32.mrb[74].mxu1 }
 0x18a   :  { %v1541_v2 = vpack.c.bf16 %v1511_v62, %v1510_v61  ;;  %v1352_v12 = vpop.f32.mrb[75].mxu1 }
 0x18b   :  { %v1334_v11 = vadd.f32 %v1333_v24, %v1173_v58  ;;  %v1176_v7 = vadd.f32 %v2979_v63, %v4301_v59 }
 0x18c   :  { %3198 = vmatmul.mubr.bf16.vlgmr.msra.gmra.mrb[96].mxu1 %v1541_v2 }
 0x18d   :  { %v1480_v15 = vmul.f32 0.01, %v1334_v11  ;;  %v1337_v10 = vadd.f32 %v1336_v41, %v1176_v7  ;;  %v2980_v19 = vpop.f32.mrb[76].mxu0  ;;  %vm1448_vm5 = vcmp.gt.f32.partialorder %v1334_v11, 0.0 }
 0x18e   :  { %v2981_v20 = vpop.f32.mrb[77].mxu0 }
 0x18f   :  { %vm1449_vm6 = vcmp.gt.f32.partialorder %v1337_v10, 0.0  ;;  %v1481_v21 = vmul.f32 0.01, %v1337_v10  ;;  %v2982_v22 = vadd.f32 %v2981_v20, %v2980_v19  ;;  %v2983_v54 = vpop.f32.mrb[78].mxu0  ;;  %v4414_v27 = vpop.f32.mrb[76].mxu1  ;;  %v1512_v35 = vsel %vm1448_vm5, %v1334_v11, %v1480_v15 }
 0x190   :  { %v2984_v23 = vpop.f32.mrb[79].mxu0  ;;  %v4417_v42 = vpop.f32.mrb[77].mxu1 }
 0x191   :  { %v1181_v24 = vadd.f32 %v2982_v22, %v4311_v14  ;;  %v2985_v59 = vadd.f32 %v2984_v23, %v2983_v54  ;;  %v1513_v38 = vsel %vm1449_vm6, %v1337_v10, %v1481_v21  ;;  %v4419_v41 = vpop.f32.mrb[78].mxu1 }
 0x192   :  { %v1542_v44 = vpack.c.bf16 %v1513_v38, %v1512_v35  ;;  %v4423_v48 = vpop.f32.mrb[79].mxu1 }
 0x193   :  { %v1342_v45 = vadd.f32 %v4395_v16, %v1181_v24  ;;  %v1184_v29 = vadd.f32 %v2985_v59, %v4313_v17 }
 0x194   :  { %3201 = vmatprep.mubr.bf16.mxu1 %v1542_v44 }
 0x195   :  { %v1482_v53 = vmul.f32 0.01, %v1342_v45  ;;  %v1345_v56 = vadd.f32 %v3156_v30, %v1184_v29  ;;  %v2986_v60 = vpop.f32.mrb[80].mxu0  ;;  %vm1450_vm7 = vcmp.gt.f32.partialorder %v1342_v45, 0.0 }
 0x196   :  { %v2987_v47 = vpop.f32.mrb[81].mxu0 }
 0x197   :  { %v1483_v14 = vmul.f32 0.01, %v1345_v56  ;;  %v2988_v50 = vadd.f32 %v2987_v47, %v2986_v60  ;;  %v2989_v61 = vpop.f32.mrb[82].mxu0  ;;  %vm1451_vm8 = vcmp.gt.f32.partialorder %v1345_v56, 0.0  ;;  %v4425_v63 = vpop.f32.mrb[80].mxu1  ;;  %v1514_v2 = vsel %vm1450_vm7, %v1342_v45, %v1482_v53 }
 0x198   :  { %v2990_v62 = vpop.f32.mrb[83].mxu0  ;;  %v4428_v11 = vpop.f32.mrb[81].mxu1 }
 0x199   :  { %v2991_v58 = vadd.f32 %v2990_v62, %v2989_v61  ;;  %v1189_v16 = vadd.f32 %v2988_v50, %v4317_v32  ;;  %v1515_v17 = vsel %vm1451_vm8, %v1345_v56, %v1483_v14  ;;  %v4430_v15 = vpop.f32.mrb[82].mxu1 }
 0x19a   :  { %v1543_v7 = vpack.c.bf16 %v1515_v17, %v1514_v2  ;;  %v4433_v19 = vpop.f32.mrb[83].mxu1 }
 0x19b   :  { %v1350_v30 = vadd.f32 %v1349_v0, %v1189_v16  ;;  %v1192_v10 = vadd.f32 %v2991_v58, %v4319_v36 }
 0x19c   :  { %3202 = vmatmul.mubr.bf16.gmra.mrb[100].mxu1 %v1543_v7 }
 0x19d   :  { %v1484_v20 = vmul.f32 0.01, %v1350_v30  ;;  %v1353_v21 = vadd.f32 %v1352_v12, %v1192_v10  ;;  %v2992_v22 = vpop.f32.mrb[84].mxu0  ;;  %vm1452_vm9 = vcmp.gt.f32.partialorder %v1350_v30, 0.0 }
 0x19e   :  { %v2993_v54 = vpop.f32.mrb[85].mxu0 }
 0x19f   :  { %vm1453_vm10 = vcmp.gt.f32.partialorder %v1353_v21, 0.0  ;;  %v1485_v32 = vmul.f32 0.01, %v1353_v21  ;;  %v2994_v23 = vadd.f32 %v2993_v54, %v2992_v22  ;;  %v2995_v24 = vpop.f32.mrb[86].mxu0  ;;  %v4435_v35 = vpop.f32.mrb[84].mxu1  ;;  %v1516_v44 = vsel %vm1452_vm9, %v1350_v30, %v1484_v20 }
 0x1a0   :  { %v2996_v59 = vpop.f32.mrb[87].mxu0  ;;  %v4438_v45 = vpop.f32.mrb[85].mxu1 }
 0x1a1   :  { %v1197_v38 = vadd.f32 %v2994_v23, %v4323_v51  ;;  %v2997_v0 = vadd.f32 %v2996_v59, %v2995_v24  ;;  %v1517_v36 = vsel %vm1453_vm10, %v1353_v21, %v1485_v32  ;;  %v4440_v53 = vpop.f32.mrb[86].mxu1 }
 0x1a2   :  { %v1544_v29 = vpack.c.bf16 %v1517_v36, %v1516_v44  ;;  %v4444_v60 = vpop.f32.mrb[87].mxu1 }
 0x1a3   :  { %v1358_v12 = vadd.f32 %v4405_v34, %v1197_v38  ;;  %v1200_v56 = vadd.f32 %v2997_v0, %v4325_v55 }
 0x1a4   :  { %3205 = vmatprep.mubr.bf16.mxu1 %v1544_v29 }
 0x1a5   :  { %v1486_v47 = vmul.f32 0.01, %v1358_v12  ;;  %v1361_v14 = vadd.f32 %v4411_v4, %v1200_v56  ;;  %v2998_v50 = vpop.f32.mrb[88].mxu0  ;;  %vm1454_vm11 = vcmp.gt.f32.partialorder %v1358_v12, 0.0 }
 0x1a6   :  { %v2999_v51 = vpop.f32.mrb[89].mxu0 }
 0x1a7   :  { %v1487_v61 = vmul.f32 0.01, %v1361_v14  ;;  %v3000_v62 = vadd.f32 %v2999_v51, %v2998_v50  ;;  %v3001_v58 = vpop.f32.mrb[90].mxu0  ;;  %vm1455_vm12 = vcmp.gt.f32.partialorder %v1361_v14, 0.0  ;;  %v4447_v2 = vpop.f32.mrb[88].mxu1  ;;  %v1518_v55 = vsel %vm1454_vm11, %v1358_v12, %v1486_v47 }
 0x1a8   :  { %v3002_v16 = vpop.f32.mrb[91].mxu0  ;;  %v4450_v30 = vpop.f32.mrb[89].mxu1 }
 0x1a9   :  { %v3003_v17 = vadd.f32 %v3002_v16, %v3001_v58  ;;  %v1205_v34 = vadd.f32 %v3000_v62, %v4329_v5  ;;  %v1519_v7 = vsel %vm1455_vm12, %v1361_v14, %v1487_v61  ;;  %v4452_v20 = vpop.f32.mrb[90].mxu1 }
 0x1aa   :  { %v1545_v10 = vpack.c.bf16 %v1519_v7, %v1518_v55  ;;  %v4456_v22 = vpop.f32.mrb[91].mxu1 }
 0x1ab   :  { %v1366_v4 = vadd.f32 %v4417_v42, %v1205_v34  ;;  %v1208_v21 = vadd.f32 %v3003_v17, %v4331_v9 }
 0x1ac   :  { %3206 = vmatmul.mubr.bf16.gmra.mrb[104].mxu1 %v1545_v10 }
 0x1ad   :  { %v1488_v54 = vmul.f32 0.01, %v1366_v4  ;;  %v1369_v32 = vadd.f32 %v4423_v48, %v1208_v21  ;;  %v3004_v23 = vpop.f32.mrb[92].mxu0  ;;  %vm1456_vm13 = vcmp.gt.f32.partialorder %v1366_v4, 0.0 }
 0x1ae   :  { %v3005_v5 = vpop.f32.mrb[93].mxu0 }
 0x1af   :  { %vm1457_vm14 = vcmp.gt.f32.partialorder %v1369_v32, 0.0  ;;  %v1489_v24 = vmul.f32 0.01, %v1369_v32  ;;  %v3006_v59 = vadd.f32 %v3005_v5, %v3004_v23  ;;  %v3007_v38 = vpop.f32.mrb[94].mxu0  ;;  %v4459_v44 = vpop.f32.mrb[92].mxu1  ;;  %v1520_v9 = vsel %vm1456_vm13, %v1366_v4, %v1488_v54 }
 0x1b0   :  { %v3008_v0 = vpop.f32.mrb[95].mxu0  ;;  %v4462_v12 = vpop.f32.mrb[93].mxu1 }
 0x1b1   :  { %v1213_v42 = vadd.f32 %v3006_v59, %v4335_v25  ;;  %v3009_v36 = vadd.f32 %v3008_v0, %v3007_v38  ;;  %v1521_v29 = vsel %vm1457_vm14, %v1369_v32, %v1489_v24  ;;  %v4464_v47 = vpop.f32.mrb[94].mxu1 }
 0x1b2   :  { %v1546_v56 = vpack.c.bf16 %v1521_v29, %v1520_v9  ;;  %v4468_v50 = vpop.f32.mrb[95].mxu1 }
 0x1b3   :  { %v1374_v48 = vadd.f32 %v4414_v27, %v1213_v42  ;;  %v1216_v14 = vadd.f32 %v3009_v36, %v4337_v28 }
 0x1b4   :  { %3209 = vmatprep.mubr.bf16.mxu1 %v1546_v56 }
 0x1b5   :  { %v1490_v51 = vmul.f32 0.01, %v1374_v48  ;;  %v1377_v61 = vadd.f32 %v4419_v41, %v1216_v14  ;;  %v3010_v62 = vpop.f32.mrb[96].mxu0  ;;  %vm1458_vm15 = vcmp.gt.f32.partialorder %v1374_v48, 0.0 }
 0x1b6   :  { %v3011_v25 = vpop.f32.mrb[97].mxu0 }
 0x1b7   :  { %v1491_v58 = vmul.f32 0.01, %v1377_v61  ;;  %v3012_v16 = vadd.f32 %v3011_v25, %v3010_v62  ;;  %v3013_v17 = vpop.f32.mrb[98].mxu0  ;;  %vm1459_vm0 = vcmp.gt.f32.partialorder %v1377_v61, 0.0  ;;  %v1522_v27 = vsel %vm1458_vm15, %v1374_v48, %v1490_v51 }
 0x1b8   :  { %v3014_v34 = vpop.f32.mrb[99].mxu0 }
 0x1b9   :  { %v3015_v55 = vadd.f32 %v3014_v34, %v3013_v17  ;;  %v1221_v7 = vadd.f32 %v3012_v16, %v4341_v46  ;;  %v1523_v10 = vsel %vm1459_vm0, %v1377_v61, %v1491_v58 }
 0x1ba   :  { %v1547_v28 = vpack.c.bf16 %v1523_v10, %v1522_v27 }
 0x1bb   :  { %v1382_v4 = vadd.f32 %v4428_v11, %v1221_v7  ;;  %v1224_v21 = vadd.f32 %v3015_v55, %v4343_v49 }
 0x1bc   :  { %3210 = vmatmul.mubr.bf16.gmra.mrb[108].mxu1 %v1547_v28 }
 0x1bd   :  { %v1492_v41 = vmul.f32 0.01, %v1382_v4  ;;  %v1385_v54 = vadd.f32 %v4433_v19, %v1224_v21  ;;  %v3016_v32 = vpop.f32.mrb[100].mxu0  ;;  %vm1460_vm1 = vcmp.gt.f32.partialorder %v1382_v4, 0.0 }
 0x1be   :  { %v3017_v23 = vpop.f32.mrb[101].mxu0 }
 0x1bf   :  { %vm1461_vm2 = vcmp.gt.f32.partialorder %v1385_v54, 0.0  ;;  %v1493_v5 = vmul.f32 0.01, %v1385_v54  ;;  %v3018_v24 = vadd.f32 %v3017_v23, %v3016_v32  ;;  %v3019_v59 = vpop.f32.mrb[102].mxu0  ;;  %v1524_v42 = vsel %vm1460_vm1, %v1382_v4, %v1492_v41 }
 0x1c0   :  { %v3020_v38 = vpop.f32.mrb[103].mxu0 }
 0x1c1   :  { %v1229_v46 = vadd.f32 %v3018_v24, %v4347_v3  ;;  %v3021_v0 = vadd.f32 %v3020_v38, %v3019_v59  ;;  %v1525_v36 = vsel %vm1461_vm2, %v1385_v54, %v1493_v5 }
 0x1c2   :  { %v1548_v11 = vpack.c.bf16 %v1525_v36, %v1524_v42 }
 0x1c3   :  { %v1390_v49 = vadd.f32 %v4425_v63, %v1229_v46  ;;  %v1232_v9 = vadd.f32 %v3021_v0, %v4349_v8 }
 0x1c4   :  { %3213 = vmatprep.mubr.bf16.mxu1 %v1548_v11 }
 0x1c5   :  { %v1494_v19 = vmul.f32 0.01, %v1390_v49  ;;  %v1393_v29 = vadd.f32 %v4430_v15, %v1232_v9  ;;  %v3022_v56 = vpop.f32.mrb[104].mxu0  ;;  %vm1462_vm3 = vcmp.gt.f32.partialorder %v1390_v49, 0.0 }
 0x1c6   :  { %v3023_v48 = vpop.f32.mrb[105].mxu0 }
 0x1c7   :  { %v1495_v14 = vmul.f32 0.01, %v1393_v29  ;;  %v3024_v51 = vadd.f32 %v3023_v48, %v3022_v56  ;;  %v3025_v61 = vpop.f32.mrb[106].mxu0  ;;  %vm1463_vm4 = vcmp.gt.f32.partialorder %v1393_v29, 0.0  ;;  %v1526_v58 = vsel %vm1462_vm3, %v1390_v49, %v1494_v19  ;;  %v3387_v56 = vld [vmem:[%s4747_s2 + $0x68] sm:$0xff]  }
 0x1c8   :  { %v3026_v3 = vpop.f32.mrb[107].mxu0  ;;  %3239 = vmatprep.subr.bf16.mxu0 %v3387_v56 }
 0x1c9   :  { %v3027_v62 = vadd.f32 %v3026_v3, %v3025_v61  ;;  %v1237_v25 = vadd.f32 %v3024_v51, %v4353_v26  ;;  %v1527_v16 = vsel %vm1463_vm4, %v1393_v29, %v1495_v14  ;;  %3240 = vmatpush3.bf16.msra.mxu0 %v3387_v56 }
 0x1ca   :  { %v1549_v63 = vpack.c.bf16 %v1527_v16, %v1526_v58 }
 0x1cb   :  { %v1398_v8 = vadd.f32 %v4438_v45, %v1237_v25  ;;  %v1240_v17 = vadd.f32 %v3027_v62, %v4355_v31  ;;  %v3388_v62 = vld [vmem:[%s4747_s2 + $0x70] sm:$0xff]  }
 0x1cc   :  { %3214 = vmatmul.mubr.bf16.gmra.mrb[112].mxu1 %v1549_v63  ;;  %3241 = vmatprep.subr.bf16.mxu0 %v3388_v62 }
 0x1cd   :  { %v1496_v15 = vmul.f32 0.01, %v1398_v8  ;;  %v1401_v34 = vadd.f32 %v4444_v60, %v1240_v17  ;;  %v3028_v55 = vpop.f32.mrb[108].mxu0  ;;  %vm1464_vm5 = vcmp.gt.f32.partialorder %v1398_v8, 0.0  ;;  %3242 = vmatpush3.bf16.msra.mxu0 %v3388_v62  ;;  %v3389_v17 = vld [vmem:[%s4747_s2 + $0x78] sm:$0xff]  }
 0x1ce   :  { %v3029_v7 = vpop.f32.mrb[109].mxu0  ;;  %3243 = vmatprep.subr.bf16.mxu0 %v3389_v17 }
 0x1cf   :  { %vm1465_vm6 = vcmp.gt.f32.partialorder %v1401_v34, 0.0  ;;  %v1497_v27 = vmul.f32 0.01, %v1401_v34  ;;  %v3030_v10 = vadd.f32 %v3029_v7, %v3028_v55  ;;  %v3031_v28 = vpop.f32.mrb[110].mxu0  ;;  %v1528_v41 = vsel %vm1464_vm5, %v1398_v8, %v1496_v15 }
 0x1d0   :  { %v3032_v4 = vpop.f32.mrb[111].mxu0 }
 0x1d1   :  { %v1245_v26 = vadd.f32 %v3030_v10, %v4359_v52  ;;  %v3033_v21 = vadd.f32 %v3032_v4, %v3031_v28  ;;  %v1529_v54 = vsel %vm1465_vm6, %v1401_v34, %v1497_v27  ;;  %3244 = vmatpush3.bf16.msra.mxu0 %v3389_v17 }
 0x1d2   :  { %v1550_v45 = vpack.c.bf16 %v1529_v54, %v1528_v41 }
 0x1d3   :  { %v1406_v31 = vadd.f32 %v4435_v35, %v1245_v26  ;;  %v1248_v32 = vadd.f32 %v3033_v21, %v4361_v57 }
 0x1d4   :  { %3217 = vmatprep.mubr.bf16.mxu1 %v1550_v45 }
 0x1d5   :  { %v1498_v60 = vmul.f32 0.01, %v1406_v31  ;;  %v1409_v23 = vadd.f32 %v4440_v53, %v1248_v32  ;;  %v3034_v5 = vpop.f32.mrb[112].mxu0  ;;  %vm1466_vm7 = vcmp.gt.f32.partialorder %v1406_v31, 0.0 }
 0x1d6   :  { %v3035_v24 = vpop.f32.mrb[113].mxu0 }
 0x1d7   :  { %v1499_v59 = vmul.f32 0.01, %v1409_v23  ;;  %v3036_v38 = vadd.f32 %v3035_v24, %v3034_v5  ;;  %v3037_v46 = vpop.f32.mrb[114].mxu0  ;;  %vm1467_vm8 = vcmp.gt.f32.partialorder %v1409_v23, 0.0  ;;  %v1530_v36 = vsel %vm1466_vm7, %v1406_v31, %v1498_v60 }
 0x1d8   :  { %v3038_v52 = vpop.f32.mrb[115].mxu0 }
 0x1d9   :  { %v3039_v0 = vadd.f32 %v3038_v52, %v3037_v46  ;;  %v1253_v42 = vadd.f32 %v3036_v38, %v4365_v13  ;;  %v1531_v11 = vsel %vm1467_vm8, %v1409_v23, %v1499_v59 }
 0x1da   :  { %v1551_v35 = vpack.c.bf16 %v1531_v11, %v1530_v36  ;;  %v3390_v36 = vld [vmem:[%s4747_s2 + $0x80] sm:$0xff]  }
 0x1db   :  { %v1414_v57 = vadd.f32 %v4450_v30, %v1253_v42  ;;  %v1256_v49 = vadd.f32 %v3039_v0, %v4367_v18  ;;  %3277 = vmatprep.subr.bf16.mxu1 %v3390_v36 }
 0x1dc   :  { %3218 = vmatmul.mubr.bf16.gmra.mrb[116].mxu1 %v1551_v35  ;;  %v3392_v35 = vld [vmem:[%s4747_s2 + $0x90] sm:$0xff]  }
 0x1dd   :  { %v1500_v53 = vmul.f32 0.01, %v1414_v57  ;;  %v1417_v9 = vadd.f32 %v4456_v22, %v1256_v49  ;;  %v3040_v19 = vpop.f32.mrb[116].mxu0  ;;  %vm1468_vm9 = vcmp.gt.f32.partialorder %v1414_v57, 0.0  ;;  %3278 = vmatpush3.bf16.msra.mxu1 %v3390_v36 }
 0x1de   :  { %v3041_v29 = vpop.f32.mrb[117].mxu0 }
 0x1df   :  { %vm1469_vm10 = vcmp.gt.f32.partialorder %v1417_v9, 0.0  ;;  %v1501_v13 = vmul.f32 0.01, %v1417_v9  ;;  %v3042_v48 = vadd.f32 %v3041_v29, %v3040_v19  ;;  %v3043_v14 = vpop.f32.mrb[118].mxu0  ;;  %v1532_v61 = vsel %vm1468_vm9, %v1414_v57, %v1500_v53 }
 0x1e0   :  { %v3044_v51 = vpop.f32.mrb[119].mxu0 }
 0x1e1   :  { %v1261_v30 = vadd.f32 %v3042_v48, %v4371_v40  ;;  %v3045_v18 = vadd.f32 %v3044_v51, %v3043_v14  ;;  %v1533_v3 = vsel %vm1469_vm10, %v1417_v9, %v1501_v13  ;;  %v3393_v14 = vld [vmem:[%s4747_s2 + $0x98] sm:$0xff]  }
 0x1e2   :  { %v1552_v22 = vpack.c.bf16 %v1533_v3, %v1532_v61 }
 0x1e3   :  { %v1422_v25 = vadd.f32 %v4447_v2, %v1261_v30  ;;  %v1264_v58 = vadd.f32 %v3045_v18, %v4373_v43 }
 0x1e4   :  { %3221 = vmatprep.mubr.bf16.mxu1 %v1552_v22 }
 0x1e5   :  { %v1502_v16 = vmul.f32 0.01, %v1422_v25  ;;  %v1425_v63 = vadd.f32 %v4452_v20, %v1264_v58  ;;  %v3046_v8 = vpop.f32.mrb[120].mxu0  ;;  %vm1470_vm11 = vcmp.gt.f32.partialorder %v1422_v25, 0.0 }
 0x1e6   :  { %v3047_v40 = vpop.f32.mrb[121].mxu0 }
 0x1e7   :  { %v1503_v15 = vmul.f32 0.01, %v1425_v63  ;;  %v3048_v34 = vadd.f32 %v3047_v40, %v3046_v8  ;;  %v3049_v55 = vpop.f32.mrb[122].mxu0  ;;  %vm1471_vm12 = vcmp.gt.f32.partialorder %v1425_v63, 0.0  ;;  %v1534_v27 = vsel %vm1470_vm11, %v1422_v25, %v1502_v16  ;;  %v3394_v25 = vld [vmem:[%s4747_s2 + $0xa0] sm:$0xff]  }
 0x1e8   :  { %v3050_v2 = vpop.f32.mrb[123].mxu0 }
 0x1e9   :  { %v3051_v43 = vadd.f32 %v3050_v2, %v3049_v55  ;;  %v1269_v7 = vadd.f32 %v3048_v34, %v4377_v1  ;;  %v1535_v10 = vsel %vm1471_vm12, %v1425_v63, %v1503_v15 }
 0x1ea   :  { %v1553_v20 = vpack.c.bf16 %v1535_v10, %v1534_v27 }
 0x1eb   :  { %v1430_v28 = vadd.f32 %v4462_v12, %v1269_v7  ;;  %v1272_v4 = vadd.f32 %v3051_v43, %v4379_v6 }
 0x1ec   :  { %3222 = vmatmul.mubr.bf16.gmra.mrb[120].mxu1 %v1553_v20 }
 0x1ed   :  { %v1504_v26 = vmul.f32 0.01, %v1430_v28  ;;  %v1433_v21 = vadd.f32 %v4468_v50, %v1272_v4  ;;  %v3052_v41 = vpop.f32.mrb[124].mxu0  ;;  %vm1472_vm13 = vcmp.gt.f32.partialorder %v1430_v28, 0.0 }
 0x1ee   :  { %v3053_v54 = vpop.f32.mrb[125].mxu0 }
 0x1ef   :  { %vm1473_vm14 = vcmp.gt.f32.partialorder %v1433_v21, 0.0  ;;  %v1505_v45 = vmul.f32 0.01, %v1433_v21  ;;  %v3054_v31 = vadd.f32 %v3053_v54, %v3052_v41  ;;  %v3055_v32 = vpop.f32.mrb[126].mxu0  ;;  %v1536_v5 = vsel %vm1472_vm13, %v1430_v28, %v1504_v26 }
 0x1f0   :  { %v3056_v1 = vpop.f32.mrb[127].mxu0 }
 0x1f1   :  { %v1277_v60 = vadd.f32 %v3054_v31, %v4383_v33  ;;  %v3057_v23 = vadd.f32 %v3056_v1, %v3055_v32  ;;  %v1537_v24 = vsel %vm1473_vm14, %v1433_v21, %v1505_v45  ;;  %v1574_v33 = vsub.s32 1, %v4205_v37 }
 0x1f2   :  { %v1554_v12 = vpack.c.bf16 %v1537_v24, %v1536_v5 }
 0x1f3   :  { %v1438_v6 = vadd.f32 %v4459_v44, %v1277_v60  ;;  %v1280_v59 = vadd.f32 %v3057_v23, %v4385_v39  ;;  %v3391_v39 = vld [vmem:[%s4747_s2 + $0x88] sm:$0xff]   ;;  %v4522_v44 = vld [vmem:[%s4748_s3] sm:$0xf] }
 0x1f4   :  { %3225 = vmatprep.mubr.bf16.mxu1 %v1554_v12  ;;  %3279 = vmatprep.subr.bf16.mxu1 %v3391_v39 }
 0x1f5   :  { %v1506_v50 = vmul.f32 0.01, %v1438_v6  ;;  %v1441_v38 = vadd.f32 %v4464_v47, %v1280_v59  ;;  %vm1474_vm15 = vcmp.gt.f32.partialorder %v1438_v6, 0.0  ;;  %v4525_v47 = vrot.slane %v4522_v44, %v1574_v33  ;;  %3280 = vmatpush3.bf16.msra.mxu1 %v3391_v39 }
 0x1f6   :  { %3281 = vmatprep.subr.bf16.mxu1 %v3392_v35 }
 0x1f7   :  { %v1507_v46 = vmul.f32 0.01, %v1441_v38  ;;  %vm1475_vm0 = vcmp.gt.f32.partialorder %v1441_v38, 0.0  ;;  %v1538_v52 = vsel %vm1474_vm15, %v1438_v6, %v1506_v50 }
 0x1f9   :  { %v1539_v0 = vsel %vm1475_vm0, %v1441_v38, %v1507_v46  ;;  %3282 = vmatpush3.bf16.msra.mxu1 %v3392_v35 }
 0x1fa   :  { %v1555_v42 = vpack.c.bf16 %v1539_v0, %v1538_v52  ;;  %3283 = vmatprep.subr.bf16.mxu1 %v3393_v14 }
 0x1fc   :  { %3226 = vmatmul.mubr.bf16.gmra.mrb[124].mxu1 %v1555_v42 }
 0x1fd   :  { %3284 = vmatpush3.bf16.msra.mxu1 %v3393_v14 }
 0x1fe   :  { %3285 = vmatprep.subr.bf16.mxu1 %v3394_v25 }
 0x201   :  { %3286 = vmatpush3.bf16.msra.mxu1 %v3394_v25 }
 0x25f   :  { %v3199_v11 = vpop.f32.mrb[96].mxu1 }
 0x260   :  { %v1667_v57 = vadd.f32 %v3199_v11, %v4525_v47  ;;  %v1658_v49 = vpop.f32.mrb[97].mxu1 }
 0x261   :  { %v1659_v53 = vadd.f32 %v1658_v49, %v4525_v47  ;;  %v3200_v9 = vpop.f32.mrb[98].mxu1 }
 0x262   :  { %v1819_v19 = vmul.f32 0.01, %v1667_v57  ;;  %v1670_v29 = vadd.f32 %v3200_v9, %v4525_v47  ;;  %v1661_v56 = vpop.f32.mrb[99].mxu1  ;;  %vm1787_vm1 = vcmp.gt.f32.partialorder %v1667_v57, 0.0 }
 0x263   :  { %v1817_v13 = vmul.f32 0.01, %v1659_v53  ;;  %v1662_v48 = vadd.f32 %v1661_v56, %v4525_v47  ;;  %vm1785_vm2 = vcmp.gt.f32.partialorder %v1659_v53, 0.0 }
 0x264   :  { %vm1788_vm3 = vcmp.gt.f32.partialorder %v1670_v29, 0.0  ;;  %v1820_v51 = vmul.f32 0.01, %v1670_v29  ;;  %v1851_v18 = vsel %vm1787_vm1, %v1667_v57, %v1819_v19 }
 0x265   :  { %vm1786_vm4 = vcmp.gt.f32.partialorder %v1662_v48, 0.0  ;;  %v1818_v30 = vmul.f32 0.01, %v1662_v48  ;;  %v1849_v22 = vsel %vm1785_vm2, %v1659_v53, %v1817_v13 }
 0x266   :  { %v1852_v61 = vsel %vm1788_vm3, %v1670_v29, %v1820_v51 }
 0x267   :  { %v1882_v3 = vpack.c.bf16 %v1852_v61, %v1851_v18  ;;  %v1850_v62 = vsel %vm1786_vm4, %v1662_v48, %v1818_v30 }
 0x268   :  { %v1881_v58 = vpack.c.bf16 %v1850_v62, %v1849_v22 }
 0x26a   :  { %3245 = vmatprep.mubr.bf16.mxu0 %v1881_v58 }
 0x26b   :  { %3246 = vmatmul.mubr.bf16.vlgmr.msra.gmra.mrb[128].mxu0 %v1882_v3 }
 0x26f   :  { %v3203_v16 = vpop.f32.mrb[100].mxu1 }
 0x270   :  { %v1683_v63 = vadd.f32 %v3203_v16, %v4525_v47  ;;  %v1674_v8 = vpop.f32.mrb[101].mxu1 }
 0x271   :  { %v1675_v40 = vadd.f32 %v1674_v8, %v4525_v47  ;;  %v3204_v17 = vpop.f32.mrb[102].mxu1 }
 0x272   :  { %v1823_v15 = vmul.f32 0.01, %v1683_v63  ;;  %v1686_v34 = vadd.f32 %v3204_v17, %v4525_v47  ;;  %v1677_v55 = vpop.f32.mrb[103].mxu1  ;;  %vm1791_vm5 = vcmp.gt.f32.partialorder %v1683_v63, 0.0 }
 0x273   :  { %v1821_v2 = vmul.f32 0.01, %v1675_v40  ;;  %v1678_v43 = vadd.f32 %v1677_v55, %v4525_v47  ;;  %vm1789_vm6 = vcmp.gt.f32.partialorder %v1675_v40, 0.0 }
 0x274   :  { %vm1792_vm7 = vcmp.gt.f32.partialorder %v1686_v34, 0.0  ;;  %v1824_v7 = vmul.f32 0.01, %v1686_v34  ;;  %v1855_v10 = vsel %vm1791_vm5, %v1683_v63, %v1823_v15 }
 0x275   :  { %vm1790_vm8 = vcmp.gt.f32.partialorder %v1678_v43, 0.0  ;;  %v1822_v27 = vmul.f32 0.01, %v1678_v43  ;;  %v1853_v28 = vsel %vm1789_vm6, %v1675_v40, %v1821_v2 }
 0x276   :  { %v1856_v20 = vsel %vm1792_vm7, %v1686_v34, %v1824_v7 }
 0x277   :  { %v1854_v4 = vsel %vm1790_vm8, %v1678_v43, %v1822_v27  ;;  %v1884_v26 = vpack.c.bf16 %v1856_v20, %v1855_v10 }
 0x278   :  { %v1883_v21 = vpack.c.bf16 %v1854_v4, %v1853_v28 }
 0x27a   :  { %3249 = vmatprep.mubr.bf16.mxu0 %v1883_v21 }
 0x27b   :  { %3250 = vmatmul.mubr.bf16.gmra.mrb[132].mxu0 %v1884_v26 }
 0x27f   :  { %v3207_v41 = vpop.f32.mrb[104].mxu1 }
 0x280   :  { %v1699_v54 = vadd.f32 %v3207_v41, %v4525_v47  ;;  %v1690_v45 = vpop.f32.mrb[105].mxu1 }
 0x281   :  { %v1691_v31 = vadd.f32 %v1690_v45, %v4525_v47  ;;  %v3208_v32 = vpop.f32.mrb[106].mxu1 }
 0x282   :  { %v1827_v1 = vmul.f32 0.01, %v1699_v54  ;;  %v1702_v60 = vadd.f32 %v3208_v32, %v4525_v47  ;;  %v1693_v23 = vpop.f32.mrb[107].mxu1  ;;  %vm1795_vm9 = vcmp.gt.f32.partialorder %v1699_v54, 0.0 }
 0x283   :  { %v1825_v5 = vmul.f32 0.01, %v1691_v31  ;;  %v1694_v24 = vadd.f32 %v1693_v23, %v4525_v47  ;;  %vm1793_vm10 = vcmp.gt.f32.partialorder %v1691_v31, 0.0 }
 0x284   :  { %vm1796_vm11 = vcmp.gt.f32.partialorder %v1702_v60, 0.0  ;;  %v1828_v12 = vmul.f32 0.01, %v1702_v60  ;;  %v1859_v59 = vsel %vm1795_vm9, %v1699_v54, %v1827_v1 }
 0x285   :  { %vm1794_vm12 = vcmp.gt.f32.partialorder %v1694_v24, 0.0  ;;  %v1826_v6 = vmul.f32 0.01, %v1694_v24  ;;  %v1857_v38 = vsel %vm1793_vm10, %v1691_v31, %v1825_v5 }
 0x286   :  { %v1860_v50 = vsel %vm1796_vm11, %v1702_v60, %v1828_v12 }
 0x287   :  { %v1858_v46 = vsel %vm1794_vm12, %v1694_v24, %v1826_v6  ;;  %v1886_v52 = vpack.c.bf16 %v1860_v50, %v1859_v59  ;;  %v3395_v6 = vld [vmem:[%s4747_s2 + $0xa8] sm:$0xff]  }
 0x288   :  { %v1885_v0 = vpack.c.bf16 %v1858_v46, %v1857_v38  ;;  %3287 = vmatprep.subr.bf16.mxu1 %v3395_v6 }
 0x289   :  { %3288 = vmatpush3.bf16.msra.mxu1 %v3395_v6 }
 0x28a   :  { %3253 = vmatprep.mubr.bf16.mxu0 %v1885_v0  ;;  %v3396_v0 = vld [vmem:[%s4747_s2 + $0xb0] sm:$0xff]  }
 0x28b   :  { %3254 = vmatmul.mubr.bf16.gmra.mrb[136].mxu0 %v1886_v52  ;;  %3289 = vmatprep.subr.bf16.mxu1 %v3396_v0 }
 0x28d   :  { %3290 = vmatpush3.bf16.msra.mxu1 %v3396_v0 }
 0x28f   :  { %v3211_v42 = vpop.f32.mrb[108].mxu1 }
 0x290   :  { %v1715_v33 = vadd.f32 %v3211_v42, %v4525_v47  ;;  %v1706_v36 = vpop.f32.mrb[109].mxu1 }
 0x291   :  { %v1707_v39 = vadd.f32 %v1706_v36, %v4525_v47  ;;  %v3212_v11 = vpop.f32.mrb[110].mxu1 }
 0x292   :  { %v1831_v35 = vmul.f32 0.01, %v1715_v33  ;;  %v1718_v57 = vadd.f32 %v3212_v11, %v4525_v47  ;;  %v1709_v49 = vpop.f32.mrb[111].mxu1  ;;  %vm1799_vm13 = vcmp.gt.f32.partialorder %v1715_v33, 0.0 }
 0x293   :  { %v1829_v53 = vmul.f32 0.01, %v1707_v39  ;;  %v1710_v9 = vadd.f32 %v1709_v49, %v4525_v47  ;;  %vm1797_vm14 = vcmp.gt.f32.partialorder %v1707_v39, 0.0  ;;  %v3397_v49 = vld [vmem:[%s4747_s2 + $0xb8] sm:$0xff]  }
 0x294   :  { %vm1800_vm15 = vcmp.gt.f32.partialorder %v1718_v57, 0.0  ;;  %v1832_v19 = vmul.f32 0.01, %v1718_v57  ;;  %v1863_v56 = vsel %vm1799_vm13, %v1715_v33, %v1831_v35  ;;  %3291 = vmatprep.subr.bf16.mxu1 %v3397_v49 }
 0x295   :  { %vm1798_vm0 = vcmp.gt.f32.partialorder %v1710_v9, 0.0  ;;  %v1830_v29 = vmul.f32 0.01, %v1710_v9  ;;  %v1861_v48 = vsel %vm1797_vm14, %v1707_v39, %v1829_v53  ;;  %3292 = vmatpush3.bf16.msra.mxu1 %v3397_v49 }
 0x296   :  { %v1864_v13 = vsel %vm1800_vm15, %v1718_v57, %v1832_v19 }
 0x297   :  { %v1862_v14 = vsel %vm1798_vm0, %v1710_v9, %v1830_v29  ;;  %v1888_v51 = vpack.c.bf16 %v1864_v13, %v1863_v56 }
 0x298   :  { %v1887_v30 = vpack.c.bf16 %v1862_v14, %v1861_v48 }
 0x29a   :  { %3257 = vmatprep.mubr.bf16.mxu0 %v1887_v30 }
 0x29b   :  { %3258 = vmatmul.mubr.bf16.gmra.mrb[140].mxu0 %v1888_v51 }
 0x29f   :  { %v3215_v18 = vpop.f32.mrb[112].mxu1 }
 0x2a0   :  { %v1731_v61 = vadd.f32 %v3215_v18, %v4525_v47  ;;  %v1722_v3 = vpop.f32.mrb[113].mxu1 }
 0x2a1   :  { %v1723_v22 = vadd.f32 %v1722_v3, %v4525_v47  ;;  %v3216_v62 = vpop.f32.mrb[114].mxu1 }
 0x2a2   :  { %v1835_v25 = vmul.f32 0.01, %v1731_v61  ;;  %v1734_v58 = vadd.f32 %v3216_v62, %v4525_v47  ;;  %v1725_v16 = vpop.f32.mrb[115].mxu1  ;;  %vm1803_vm1 = vcmp.gt.f32.partialorder %v1731_v61, 0.0 }
 0x2a3   :  { %v1833_v63 = vmul.f32 0.01, %v1723_v22  ;;  %v1726_v8 = vadd.f32 %v1725_v16, %v4525_v47  ;;  %vm1801_vm2 = vcmp.gt.f32.partialorder %v1723_v22, 0.0 }
 0x2a4   :  { %vm1804_vm3 = vcmp.gt.f32.partialorder %v1734_v58, 0.0  ;;  %v1836_v40 = vmul.f32 0.01, %v1734_v58  ;;  %v1867_v15 = vsel %vm1803_vm1, %v1731_v61, %v1835_v25 }
 0x2a5   :  { %vm1802_vm4 = vcmp.gt.f32.partialorder %v1726_v8, 0.0  ;;  %v1834_v17 = vmul.f32 0.01, %v1726_v8  ;;  %v1865_v55 = vsel %vm1801_vm2, %v1723_v22, %v1833_v63 }
 0x2a6   :  { %v1868_v34 = vsel %vm1804_vm3, %v1734_v58, %v1836_v40 }
 0x2a7   :  { %v1866_v2 = vsel %vm1802_vm4, %v1726_v8, %v1834_v17  ;;  %v1890_v43 = vpack.c.bf16 %v1868_v34, %v1867_v15 }
 0x2a8   :  { %v1889_v7 = vpack.c.bf16 %v1866_v2, %v1865_v55  ;;  %v1916_v55 = vsub.s32 2, %v4205_v37 }
 0x2aa   :  { %3261 = vmatprep.mubr.bf16.mxu0 %v1889_v7  ;;  %v4579_v2 = vrot.slane %v4522_v44, %v1916_v55 }
 0x2ab   :  { %3262 = vmatmul.mubr.bf16.gmra.mrb[144].mxu0 %v1890_v43 }
 0x2af   :  { %v3219_v27 = vpop.f32.mrb[116].mxu1 }
 0x2b0   :  { %v1747_v10 = vadd.f32 %v3219_v27, %v4525_v47  ;;  %v1738_v20 = vpop.f32.mrb[117].mxu1 }
 0x2b1   :  { %v1739_v28 = vadd.f32 %v1738_v20, %v4525_v47  ;;  %v3220_v4 = vpop.f32.mrb[118].mxu1 }
 0x2b2   :  { %v1839_v26 = vmul.f32 0.01, %v1747_v10  ;;  %v1750_v21 = vadd.f32 %v3220_v4, %v4525_v47  ;;  %v1741_v41 = vpop.f32.mrb[119].mxu1  ;;  %vm1807_vm5 = vcmp.gt.f32.partialorder %v1747_v10, 0.0 }
 0x2b3   :  { %v1837_v54 = vmul.f32 0.01, %v1739_v28  ;;  %v1742_v45 = vadd.f32 %v1741_v41, %v4525_v47  ;;  %vm1805_vm6 = vcmp.gt.f32.partialorder %v1739_v28, 0.0 }
 0x2b4   :  { %vm1808_vm7 = vcmp.gt.f32.partialorder %v1750_v21, 0.0  ;;  %v1840_v31 = vmul.f32 0.01, %v1750_v21  ;;  %v1871_v1 = vsel %vm1807_vm5, %v1747_v10, %v1839_v26 }
 0x2b5   :  { %vm1806_vm8 = vcmp.gt.f32.partialorder %v1742_v45, 0.0  ;;  %v1838_v32 = vmul.f32 0.01, %v1742_v45  ;;  %v1869_v23 = vsel %vm1805_vm6, %v1739_v28, %v1837_v54 }
 0x2b6   :  { %v1872_v60 = vsel %vm1808_vm7, %v1750_v21, %v1840_v31 }
 0x2b7   :  { %v1870_v5 = vsel %vm1806_vm8, %v1742_v45, %v1838_v32  ;;  %v1892_v24 = vpack.c.bf16 %v1872_v60, %v1871_v1 }
 0x2b8   :  { %v1891_v12 = vpack.c.bf16 %v1870_v5, %v1869_v23 }
 0x2ba   :  { %3265 = vmatprep.mubr.bf16.mxu0 %v1891_v12 }
 0x2bb   :  { %3266 = vmatmul.mubr.bf16.gmra.mrb[148].mxu0 %v1892_v24 }
 0x2bf   :  { %v3223_v59 = vpop.f32.mrb[120].mxu1 }
 0x2c0   :  { %v1763_v50 = vadd.f32 %v3223_v59, %v4525_v47  ;;  %v1754_v38 = vpop.f32.mrb[121].mxu1 }
 0x2c1   :  { %v1755_v46 = vadd.f32 %v1754_v38, %v4525_v47  ;;  %v3224_v52 = vpop.f32.mrb[122].mxu1 }
 0x2c2   :  { %v1843_v42 = vmul.f32 0.01, %v1763_v50  ;;  %v1766_v33 = vadd.f32 %v3224_v52, %v4525_v47  ;;  %v1757_v36 = vpop.f32.mrb[123].mxu1  ;;  %vm1811_vm9 = vcmp.gt.f32.partialorder %v1763_v50, 0.0 }
 0x2c3   :  { %v1841_v39 = vmul.f32 0.01, %v1755_v46  ;;  %v1758_v11 = vadd.f32 %v1757_v36, %v4525_v47  ;;  %vm1809_vm10 = vcmp.gt.f32.partialorder %v1755_v46, 0.0 }
 0x2c4   :  { %vm1812_vm11 = vcmp.gt.f32.partialorder %v1766_v33, 0.0  ;;  %v1844_v35 = vmul.f32 0.01, %v1766_v33  ;;  %v1875_v53 = vsel %vm1811_vm9, %v1763_v50, %v1843_v42 }
 0x2c5   :  { %vm1810_vm12 = vcmp.gt.f32.partialorder %v1758_v11, 0.0  ;;  %v1842_v57 = vmul.f32 0.01, %v1758_v11  ;;  %v1873_v19 = vsel %vm1809_vm10, %v1755_v46, %v1841_v39 }
 0x2c6   :  { %v1876_v9 = vsel %vm1812_vm11, %v1766_v33, %v1844_v35 }
 0x2c7   :  { %v1874_v29 = vsel %vm1810_vm12, %v1758_v11, %v1842_v57  ;;  %v1894_v56 = vpack.c.bf16 %v1876_v9, %v1875_v53 }
 0x2c8   :  { %v1893_v13 = vpack.c.bf16 %v1874_v29, %v1873_v19 }
 0x2ca   :  { %3269 = vmatprep.mubr.bf16.mxu0 %v1893_v13 }
 0x2cb   :  { %3270 = vmatmul.mubr.bf16.gmra.mrb[152].mxu0 %v1894_v56 }
 0x2cf   :  { %v3227_v48 = vpop.f32.mrb[124].mxu1 }
 0x2d0   :  { %v1779_v14 = vadd.f32 %v3227_v48, %v4525_v47  ;;  %v1770_v51 = vpop.f32.mrb[125].mxu1 }
 0x2d1   :  { %v1771_v30 = vadd.f32 %v1770_v51, %v4525_v47  ;;  %v3228_v18 = vpop.f32.mrb[126].mxu1 }
 0x2d2   :  { %v1847_v61 = vmul.f32 0.01, %v1779_v14  ;;  %v1782_v3 = vadd.f32 %v3228_v18, %v4525_v47  ;;  %v1773_v22 = vpop.f32.mrb[127].mxu1  ;;  %vm1815_vm13 = vcmp.gt.f32.partialorder %v1779_v14, 0.0 }
 0x2d3   :  { %v1845_v62 = vmul.f32 0.01, %v1771_v30  ;;  %v1774_v25 = vadd.f32 %v1773_v22, %v4525_v47  ;;  %vm1813_vm14 = vcmp.gt.f32.partialorder %v1771_v30, 0.0 }
 0x2d4   :  { %vm1816_vm15 = vcmp.gt.f32.partialorder %v1782_v3, 0.0  ;;  %v1848_v58 = vmul.f32 0.01, %v1782_v3  ;;  %v1879_v63 = vsel %vm1815_vm13, %v1779_v14, %v1847_v61 }
 0x2d5   :  { %vm1814_vm0 = vcmp.gt.f32.partialorder %v1774_v25, 0.0  ;;  %v1846_v16 = vmul.f32 0.01, %v1774_v25  ;;  %v1877_v40 = vsel %vm1813_vm14, %v1771_v30, %v1845_v62 }
 0x2d6   :  { %v1880_v8 = vsel %vm1816_vm15, %v1782_v3, %v1848_v58 }
 0x2d7   :  { %v1878_v17 = vsel %vm1814_vm0, %v1774_v25, %v1846_v16  ;;  %v1896_v15 = vpack.c.bf16 %v1880_v8, %v1879_v63 }
 0x2d8   :  { %v1895_v34 = vpack.c.bf16 %v1878_v17, %v1877_v40 }
 0x2da   :  { %3273 = vmatprep.mubr.bf16.mxu0 %v1895_v34 }
 0x2db   :  { %3274 = vmatmul.mubr.bf16.gmra.mrb[156].mxu0 %v1896_v15 }
 0x33e   :  { %v3247_v43 = vpop.f32.mrb[128].mxu0 }
 0x33f   :  { %v2009_v47 = vadd.f32 %v3247_v43, %v4579_v2  ;;  %v2000_v7 = vpop.f32.mrb[129].mxu0 }
 0x340   :  { %v2001_v27 = vadd.f32 %v2000_v7, %v4579_v2  ;;  %v3248_v10 = vpop.f32.mrb[130].mxu0 }
 0x341   :  { %v2161_v20 = vmul.f32 0.01, %v2009_v47  ;;  %v2012_v28 = vadd.f32 %v3248_v10, %v4579_v2  ;;  %v2003_v4 = vpop.f32.mrb[131].mxu0  ;;  %vm2129_vm1 = vcmp.gt.f32.partialorder %v2009_v47, 0.0 }
 0x342   :  { %v2159_v26 = vmul.f32 0.01, %v2001_v27  ;;  %v2004_v21 = vadd.f32 %v2003_v4, %v4579_v2  ;;  %vm2127_vm2 = vcmp.gt.f32.partialorder %v2001_v27, 0.0 }
 0x343   :  { %vm2130_vm3 = vcmp.gt.f32.partialorder %v2012_v28, 0.0  ;;  %v2162_v41 = vmul.f32 0.01, %v2012_v28  ;;  %v2193_v45 = vsel %vm2129_vm1, %v2009_v47, %v2161_v20 }
 0x344   :  { %vm2128_vm4 = vcmp.gt.f32.partialorder %v2004_v21, 0.0  ;;  %v2160_v54 = vmul.f32 0.01, %v2004_v21  ;;  %v2191_v1 = vsel %vm2127_vm2, %v2001_v27, %v2159_v26 }
 0x345   :  { %v2194_v31 = vsel %vm2130_vm3, %v2012_v28, %v2162_v41 }
 0x346   :  { %v2224_v32 = vpack.c.bf16 %v2194_v31, %v2193_v45  ;;  %v2192_v60 = vsel %vm2128_vm4, %v2004_v21, %v2160_v54 }
 0x347   :  { %v2223_v23 = vpack.c.bf16 %v2192_v60, %v2191_v1 }
 0x349   :  { %3293 = vmatprep.mubr.bf16.mxu1 %v2223_v23 }
 0x34a   :  { %3294 = vmatmul.mubr.bf16.vlgmr.msra.gmra.mrb[128].mxu1 %v2224_v32 }
 0x34e   :  { %v3251_v5 = vpop.f32.mrb[132].mxu0 }
 0x34f   :  { %v2025_v24 = vadd.f32 %v3251_v5, %v4579_v2  ;;  %v2016_v12 = vpop.f32.mrb[133].mxu0 }
 0x350   :  { %v2017_v6 = vadd.f32 %v2016_v12, %v4579_v2  ;;  %v3252_v59 = vpop.f32.mrb[134].mxu0 }
 0x351   :  { %v2165_v50 = vmul.f32 0.01, %v2025_v24  ;;  %v2028_v38 = vadd.f32 %v3252_v59, %v4579_v2  ;;  %v2019_v46 = vpop.f32.mrb[135].mxu0  ;;  %vm2133_vm5 = vcmp.gt.f32.partialorder %v2025_v24, 0.0 }
 0x352   :  { %v2163_v52 = vmul.f32 0.01, %v2017_v6  ;;  %v2020_v0 = vadd.f32 %v2019_v46, %v4579_v2  ;;  %vm2131_vm6 = vcmp.gt.f32.partialorder %v2017_v6, 0.0 }
 0x353   :  { %vm2134_vm7 = vcmp.gt.f32.partialorder %v2028_v38, 0.0  ;;  %v2166_v42 = vmul.f32 0.01, %v2028_v38  ;;  %v2197_v36 = vsel %vm2133_vm5, %v2025_v24, %v2165_v50 }
 0x354   :  { %vm2132_vm8 = vcmp.gt.f32.partialorder %v2020_v0, 0.0  ;;  %v2164_v33 = vmul.f32 0.01, %v2020_v0  ;;  %v2195_v11 = vsel %vm2131_vm6, %v2017_v6, %v2163_v52 }
 0x355   :  { %v2198_v39 = vsel %vm2134_vm7, %v2028_v38, %v2166_v42 }
 0x356   :  { %v2196_v35 = vsel %vm2132_vm8, %v2020_v0, %v2164_v33  ;;  %v2226_v57 = vpack.c.bf16 %v2198_v39, %v2197_v36 }
 0x357   :  { %v2225_v49 = vpack.c.bf16 %v2196_v35, %v2195_v11 }
 0x359   :  { %3297 = vmatprep.mubr.bf16.mxu1 %v2225_v49 }
 0x35a   :  { %3298 = vmatmul.mubr.bf16.gmra.mrb[132].mxu1 %v2226_v57 }
 0x35e   :  { %v3255_v53 = vpop.f32.mrb[136].mxu0 }
 0x35f   :  { %v2041_v9 = vadd.f32 %v3255_v53, %v4579_v2  ;;  %v2032_v19 = vpop.f32.mrb[137].mxu0 }
 0x360   :  { %v2033_v29 = vadd.f32 %v2032_v19, %v4579_v2  ;;  %v3256_v56 = vpop.f32.mrb[138].mxu0 }
 0x361   :  { %v2169_v13 = vmul.f32 0.01, %v2041_v9  ;;  %v2044_v48 = vadd.f32 %v3256_v56, %v4579_v2  ;;  %v2035_v14 = vpop.f32.mrb[139].mxu0  ;;  %vm2137_vm9 = vcmp.gt.f32.partialorder %v2041_v9, 0.0 }
 0x362   :  { %v2167_v51 = vmul.f32 0.01, %v2033_v29  ;;  %v2036_v30 = vadd.f32 %v2035_v14, %v4579_v2  ;;  %vm2135_vm10 = vcmp.gt.f32.partialorder %v2033_v29, 0.0 }
 0x363   :  { %vm2138_vm11 = vcmp.gt.f32.partialorder %v2044_v48, 0.0  ;;  %v2170_v18 = vmul.f32 0.01, %v2044_v48  ;;  %v2201_v3 = vsel %vm2137_vm9, %v2041_v9, %v2169_v13 }
 0x364   :  { %vm2136_vm12 = vcmp.gt.f32.partialorder %v2036_v30, 0.0  ;;  %v2168_v61 = vmul.f32 0.01, %v2036_v30  ;;  %v2199_v62 = vsel %vm2135_vm10, %v2033_v29, %v2167_v51 }
 0x365   :  { %v2202_v22 = vsel %vm2138_vm11, %v2044_v48, %v2170_v18 }
 0x366   :  { %v2200_v25 = vsel %vm2136_vm12, %v2036_v30, %v2168_v61  ;;  %v2228_v58 = vpack.c.bf16 %v2202_v22, %v2201_v3 }
 0x367   :  { %v2227_v16 = vpack.c.bf16 %v2200_v25, %v2199_v62 }
 0x369   :  { %3301 = vmatprep.mubr.bf16.mxu1 %v2227_v16 }
 0x36a   :  { %3302 = vmatmul.mubr.bf16.gmra.mrb[136].mxu1 %v2228_v58 }
 0x36e   :  { %v3259_v63 = vpop.f32.mrb[140].mxu0 }
 0x36f   :  { %v2057_v8 = vadd.f32 %v3259_v63, %v4579_v2  ;;  %v2048_v40 = vpop.f32.mrb[141].mxu0 }
 0x370   :  { %v2049_v17 = vadd.f32 %v2048_v40, %v4579_v2  ;;  %v3260_v15 = vpop.f32.mrb[142].mxu0 }
 0x371   :  { %v2173_v34 = vmul.f32 0.01, %v2057_v8  ;;  %v2060_v55 = vadd.f32 %v3260_v15, %v4579_v2  ;;  %v2051_v43 = vpop.f32.mrb[143].mxu0  ;;  %vm2141_vm13 = vcmp.gt.f32.partialorder %v2057_v8, 0.0 }
 0x372   :  { %v2171_v47 = vmul.f32 0.01, %v2049_v17  ;;  %v2052_v7 = vadd.f32 %v2051_v43, %v4579_v2  ;;  %vm2139_vm14 = vcmp.gt.f32.partialorder %v2049_v17, 0.0 }
 0x373   :  { %vm2142_vm15 = vcmp.gt.f32.partialorder %v2060_v55, 0.0  ;;  %v2174_v27 = vmul.f32 0.01, %v2060_v55  ;;  %v2205_v20 = vsel %vm2141_vm13, %v2057_v8, %v2173_v34 }
 0x374   :  { %vm2140_vm0 = vcmp.gt.f32.partialorder %v2052_v7, 0.0  ;;  %v2172_v10 = vmul.f32 0.01, %v2052_v7  ;;  %v2203_v4 = vsel %vm2139_vm14, %v2049_v17, %v2171_v47 }
 0x375   :  { %v2206_v28 = vsel %vm2142_vm15, %v2060_v55, %v2174_v27 }
 0x376   :  { %v2204_v26 = vsel %vm2140_vm0, %v2052_v7, %v2172_v10  ;;  %v2230_v21 = vpack.c.bf16 %v2206_v28, %v2205_v20 }
 0x377   :  { %v2229_v41 = vpack.c.bf16 %v2204_v26, %v2203_v4 }
 0x379   :  { %3305 = vmatprep.mubr.bf16.mxu1 %v2229_v41 }
 0x37a   :  { %3306 = vmatmul.mubr.bf16.gmra.mrb[140].mxu1 %v2230_v21 }
 0x37e   :  { %v3263_v54 = vpop.f32.mrb[144].mxu0 }
 0x37f   :  { %v2073_v45 = vadd.f32 %v3263_v54, %v4579_v2  ;;  %v2064_v31 = vpop.f32.mrb[145].mxu0 }
 0x380   :  { %v2065_v32 = vadd.f32 %v2064_v31, %v4579_v2  ;;  %v3264_v1 = vpop.f32.mrb[146].mxu0 }
 0x381   :  { %v2177_v60 = vmul.f32 0.01, %v2073_v45  ;;  %v2076_v23 = vadd.f32 %v3264_v1, %v4579_v2  ;;  %v2067_v5 = vpop.f32.mrb[147].mxu0  ;;  %vm2145_vm1 = vcmp.gt.f32.partialorder %v2073_v45, 0.0 }
 0x382   :  { %v2175_v24 = vmul.f32 0.01, %v2065_v32  ;;  %v2068_v12 = vadd.f32 %v2067_v5, %v4579_v2  ;;  %vm2143_vm2 = vcmp.gt.f32.partialorder %v2065_v32, 0.0 }
 0x383   :  { %vm2146_vm3 = vcmp.gt.f32.partialorder %v2076_v23, 0.0  ;;  %v2178_v6 = vmul.f32 0.01, %v2076_v23  ;;  %v2209_v50 = vsel %vm2145_vm1, %v2073_v45, %v2177_v60 }
 0x384   :  { %vm2144_vm4 = vcmp.gt.f32.partialorder %v2068_v12, 0.0  ;;  %v2176_v59 = vmul.f32 0.01, %v2068_v12  ;;  %v2207_v46 = vsel %vm2143_vm2, %v2065_v32, %v2175_v24 }
 0x385   :  { %v2210_v38 = vsel %vm2146_vm3, %v2076_v23, %v2178_v6 }
 0x386   :  { %v2208_v52 = vsel %vm2144_vm4, %v2068_v12, %v2176_v59  ;;  %v2232_v0 = vpack.c.bf16 %v2210_v38, %v2209_v50  ;;  %v2258_v59 = vsub.s32 3, %v4205_v37 }
 0x387   :  { %v2231_v42 = vpack.c.bf16 %v2208_v52, %v2207_v46 }
 0x388   :  { %v4615_v50 = vrot.slane %v4522_v44, %v2258_v59 }
 0x389   :  { %3309 = vmatprep.mubr.bf16.mxu1 %v2231_v42 }
 0x38a   :  { %3310 = vmatmul.mubr.bf16.gmra.mrb[144].mxu1 %v2232_v0 }
 0x38e   :  { %v3267_v33 = vpop.f32.mrb[148].mxu0 }
 0x38f   :  { %v2089_v36 = vadd.f32 %v3267_v33, %v4579_v2  ;;  %v2080_v39 = vpop.f32.mrb[149].mxu0 }
 0x390   :  { %v2081_v11 = vadd.f32 %v2080_v39, %v4579_v2  ;;  %v3268_v35 = vpop.f32.mrb[150].mxu0 }
 0x391   :  { %v2181_v57 = vmul.f32 0.01, %v2089_v36  ;;  %v2092_v49 = vadd.f32 %v3268_v35, %v4579_v2  ;;  %v2083_v53 = vpop.f32.mrb[151].mxu0  ;;  %vm2149_vm5 = vcmp.gt.f32.partialorder %v2089_v36, 0.0 }
 0x392   :  { %v2179_v9 = vmul.f32 0.01, %v2081_v11  ;;  %v2084_v19 = vadd.f32 %v2083_v53, %v4579_v2  ;;  %vm2147_vm6 = vcmp.gt.f32.partialorder %v2081_v11, 0.0 }
 0x393   :  { %vm2150_vm7 = vcmp.gt.f32.partialorder %v2092_v49, 0.0  ;;  %v2182_v29 = vmul.f32 0.01, %v2092_v49  ;;  %v2213_v13 = vsel %vm2149_vm5, %v2089_v36, %v2181_v57 }
 0x394   :  { %vm2148_vm8 = vcmp.gt.f32.partialorder %v2084_v19, 0.0  ;;  %v2180_v56 = vmul.f32 0.01, %v2084_v19  ;;  %v2211_v14 = vsel %vm2147_vm6, %v2081_v11, %v2179_v9 }
 0x395   :  { %v2214_v48 = vsel %vm2150_vm7, %v2092_v49, %v2182_v29 }
 0x396   :  { %v2212_v51 = vsel %vm2148_vm8, %v2084_v19, %v2180_v56  ;;  %v2234_v30 = vpack.c.bf16 %v2214_v48, %v2213_v13 }
 0x397   :  { %v2233_v18 = vpack.c.bf16 %v2212_v51, %v2211_v14 }
 0x399   :  { %3313 = vmatprep.mubr.bf16.mxu1 %v2233_v18 }
 0x39a   :  { %3314 = vmatmul.mubr.bf16.gmra.mrb[148].mxu1 %v2234_v30 }
 0x39e   :  { %v3271_v61 = vpop.f32.mrb[152].mxu0 }
 0x39f   :  { %v2105_v3 = vadd.f32 %v3271_v61, %v4579_v2  ;;  %v2096_v22 = vpop.f32.mrb[153].mxu0 }
 0x3a0   :  { %v2097_v62 = vadd.f32 %v2096_v22, %v4579_v2  ;;  %v3272_v25 = vpop.f32.mrb[154].mxu0 }
 0x3a1   :  { %v2185_v58 = vmul.f32 0.01, %v2105_v3  ;;  %v2108_v16 = vadd.f32 %v3272_v25, %v4579_v2  ;;  %v2099_v63 = vpop.f32.mrb[155].mxu0  ;;  %vm2153_vm9 = vcmp.gt.f32.partialorder %v2105_v3, 0.0 }
 0x3a2   :  { %v2183_v8 = vmul.f32 0.01, %v2097_v62  ;;  %v2100_v40 = vadd.f32 %v2099_v63, %v4579_v2  ;;  %vm2151_vm10 = vcmp.gt.f32.partialorder %v2097_v62, 0.0 }
 0x3a3   :  { %vm2154_vm11 = vcmp.gt.f32.partialorder %v2108_v16, 0.0  ;;  %v2186_v17 = vmul.f32 0.01, %v2108_v16  ;;  %v2217_v34 = vsel %vm2153_vm9, %v2105_v3, %v2185_v58 }
 0x3a4   :  { %vm2152_vm12 = vcmp.gt.f32.partialorder %v2100_v40, 0.0  ;;  %v2184_v15 = vmul.f32 0.01, %v2100_v40  ;;  %v2215_v43 = vsel %vm2151_vm10, %v2097_v62, %v2183_v8 }
 0x3a5   :  { %v2218_v55 = vsel %vm2154_vm11, %v2108_v16, %v2186_v17 }
 0x3a6   :  { %v2216_v47 = vsel %vm2152_vm12, %v2100_v40, %v2184_v15  ;;  %v2236_v7 = vpack.c.bf16 %v2218_v55, %v2217_v34 }
 0x3a7   :  { %v2235_v27 = vpack.c.bf16 %v2216_v47, %v2215_v43 }
 0x3a9   :  { %3317 = vmatprep.mubr.bf16.mxu1 %v2235_v27 }
 0x3aa   :  { %3318 = vmatmul.mubr.bf16.gmra.mrb[152].mxu1 %v2236_v7 }
 0x3ae   :  { %v3275_v10 = vpop.f32.mrb[156].mxu0 }
 0x3af   :  { %v2121_v20 = vadd.f32 %v3275_v10, %v4579_v2  ;;  %v2112_v28 = vpop.f32.mrb[157].mxu0 }
 0x3b0   :  { %v2113_v4 = vadd.f32 %v2112_v28, %v4579_v2  ;;  %v3276_v26 = vpop.f32.mrb[158].mxu0 }
 0x3b1   :  { %v2189_v21 = vmul.f32 0.01, %v2121_v20  ;;  %v2124_v41 = vadd.f32 %v3276_v26, %v4579_v2  ;;  %v2115_v54 = vpop.f32.mrb[159].mxu0  ;;  %vm2157_vm13 = vcmp.gt.f32.partialorder %v2121_v20, 0.0 }
 0x3b2   :  { %v2187_v45 = vmul.f32 0.01, %v2113_v4  ;;  %v2116_v31 = vadd.f32 %v2115_v54, %v4579_v2  ;;  %vm2155_vm14 = vcmp.gt.f32.partialorder %v2113_v4, 0.0 }
 0x3b3   :  { %vm2158_vm15 = vcmp.gt.f32.partialorder %v2124_v41, 0.0  ;;  %v2190_v32 = vmul.f32 0.01, %v2124_v41  ;;  %v2221_v60 = vsel %vm2157_vm13, %v2121_v20, %v2189_v21 }
 0x3b4   :  { %vm2156_vm0 = vcmp.gt.f32.partialorder %v2116_v31, 0.0  ;;  %v2188_v1 = vmul.f32 0.01, %v2116_v31  ;;  %v2219_v5 = vsel %vm2155_vm14, %v2113_v4, %v2187_v45 }
 0x3b5   :  { %v2222_v23 = vsel %vm2158_vm15, %v2124_v41, %v2190_v32 }
 0x3b6   :  { %v2220_v24 = vsel %vm2156_vm0, %v2116_v31, %v2188_v1  ;;  %v2238_v12 = vpack.c.bf16 %v2222_v23, %v2221_v60 }
 0x3b7   :  { %v2237_v6 = vpack.c.bf16 %v2220_v24, %v2219_v5 }
 0x3b9   :  { %3321 = vmatprep.mubr.bf16.mxu1 %v2237_v6 }
 0x3ba   :  { %3322 = vmatmul.mubr.bf16.gmra.mrb[156].mxu1 %v2238_v12 }
 0x41d   :  { %v3295_v38 = vpop.f32.mrb[128].mxu1 }
 0x41e   :  { %v2351_v2 = vadd.f32 %v3295_v38, %v4615_v50  ;;  %v2342_v46 = vpop.f32.mrb[129].mxu1 }
 0x41f   :  { %v2343_v52 = vadd.f32 %v2342_v46, %v4615_v50  ;;  %v3296_v0 = vpop.f32.mrb[130].mxu1 }
 0x420   :  { %vm2471_vm1 = vcmp.gt.f32.partialorder %v2351_v2, 0.0  ;;  %v2503_v42 = vmul.f32 0.01, %v2351_v2  ;;  %v2354_v33 = vadd.f32 %v3296_v0, %v4615_v50  ;;  %v2345_v36 = vpop.f32.mrb[131].mxu1 }
 0x421   :  { %vm2469_vm2 = vcmp.gt.f32.partialorder %v2343_v52, 0.0  ;;  %v2501_v39 = vmul.f32 0.01, %v2343_v52  ;;  %v2346_v11 = vadd.f32 %v2345_v36, %v4615_v50 }
 0x422   :  { %v2535_v37 = vsel %vm2471_vm1, %v2351_v2, %v2503_v42  ;;  %vm2472_vm3 = vcmp.gt.f32.partialorder %v2354_v33, 0.0  ;;  %v2504_v44 = vmul.f32 0.01, %v2354_v33 }
 0x423   :  { %2567 = vst [vmem:[%s4749_s4 + $0x10] sm:$0xff] %v2535_v37  ;;  %v2533_v35 = vsel %vm2469_vm2, %v2343_v52, %v2501_v39  ;;  %vm2470_vm4 = vcmp.gt.f32.partialorder %v2346_v11, 0.0  ;;  %v2502_v57 = vmul.f32 0.01, %v2346_v11 }
 0x424   :  { %2565 = vst [vmem:[%s4749_s4] sm:$0xff] %v2533_v35  ;;  %v2536_v49 = vsel %vm2472_vm3, %v2354_v33, %v2504_v44 }
 0x425   :  { %2568 = vst [vmem:[%s4749_s4 + $0x18] sm:$0xff] %v2536_v49  ;;  %v2534_v53 = vsel %vm2470_vm4, %v2346_v11, %v2502_v57 }
 0x426   :  { %2566 = vst [vmem:[%s4749_s4 + $0x8] sm:$0xff] %v2534_v53 }
 0x42d   :  { %v3299_v9 = vpop.f32.mrb[132].mxu1 }
 0x42e   :  { %v2367_v19 = vadd.f32 %v3299_v9, %v4615_v50  ;;  %v2358_v29 = vpop.f32.mrb[133].mxu1 }
 0x42f   :  { %v2359_v56 = vadd.f32 %v2358_v29, %v4615_v50  ;;  %v3300_v13 = vpop.f32.mrb[134].mxu1 }
 0x430   :  { %vm2475_vm5 = vcmp.gt.f32.partialorder %v2367_v19, 0.0  ;;  %v2507_v48 = vmul.f32 0.01, %v2367_v19  ;;  %v2370_v14 = vadd.f32 %v3300_v13, %v4615_v50  ;;  %v2361_v51 = vpop.f32.mrb[135].mxu1 }
 0x431   :  { %vm2473_vm6 = vcmp.gt.f32.partialorder %v2359_v56, 0.0  ;;  %v2505_v30 = vmul.f32 0.01, %v2359_v56  ;;  %v2362_v18 = vadd.f32 %v2361_v51, %v4615_v50 }
 0x432   :  { %v2539_v61 = vsel %vm2475_vm5, %v2367_v19, %v2507_v48  ;;  %vm2476_vm7 = vcmp.gt.f32.partialorder %v2370_v14, 0.0  ;;  %v2508_v3 = vmul.f32 0.01, %v2370_v14 }
 0x433   :  { %2571 = vst [vmem:[%s4749_s4 + $0x30] sm:$0xff] %v2539_v61  ;;  %v2537_v22 = vsel %vm2473_vm6, %v2359_v56, %v2505_v30  ;;  %vm2474_vm8 = vcmp.gt.f32.partialorder %v2362_v18, 0.0  ;;  %v2506_v62 = vmul.f32 0.01, %v2362_v18 }
 0x434   :  { %2569 = vst [vmem:[%s4749_s4 + $0x20] sm:$0xff] %v2537_v22  ;;  %v2540_v25 = vsel %vm2476_vm7, %v2370_v14, %v2508_v3 }
 0x435   :  { %2572 = vst [vmem:[%s4749_s4 + $0x38] sm:$0xff] %v2540_v25  ;;  %v2538_v58 = vsel %vm2474_vm8, %v2362_v18, %v2506_v62 }
 0x436   :  { %2570 = vst [vmem:[%s4749_s4 + $0x28] sm:$0xff] %v2538_v58 }
 0x43d   :  { %v3303_v16 = vpop.f32.mrb[136].mxu1 }
 0x43e   :  { %v2383_v63 = vadd.f32 %v3303_v16, %v4615_v50  ;;  %v2374_v8 = vpop.f32.mrb[137].mxu1 }
 0x43f   :  { %v2375_v40 = vadd.f32 %v2374_v8, %v4615_v50  ;;  %v3304_v17 = vpop.f32.mrb[138].mxu1 }
 0x440   :  { %vm2479_vm9 = vcmp.gt.f32.partialorder %v2383_v63, 0.0  ;;  %v2511_v15 = vmul.f32 0.01, %v2383_v63  ;;  %v2386_v34 = vadd.f32 %v3304_v17, %v4615_v50  ;;  %v2377_v55 = vpop.f32.mrb[139].mxu1 }
 0x441   :  { %vm2477_vm10 = vcmp.gt.f32.partialorder %v2375_v40, 0.0  ;;  %v2509_v43 = vmul.f32 0.01, %v2375_v40  ;;  %v2378_v47 = vadd.f32 %v2377_v55, %v4615_v50 }
 0x442   :  { %v2543_v7 = vsel %vm2479_vm9, %v2383_v63, %v2511_v15  ;;  %vm2480_vm11 = vcmp.gt.f32.partialorder %v2386_v34, 0.0  ;;  %v2512_v27 = vmul.f32 0.01, %v2386_v34 }
 0x443   :  { %2575 = vst [vmem:[%s4749_s4 + $0x50] sm:$0xff] %v2543_v7  ;;  %v2541_v10 = vsel %vm2477_vm10, %v2375_v40, %v2509_v43  ;;  %vm2478_vm12 = vcmp.gt.f32.partialorder %v2378_v47, 0.0  ;;  %v2510_v20 = vmul.f32 0.01, %v2378_v47 }
 0x444   :  { %2573 = vst [vmem:[%s4749_s4 + $0x40] sm:$0xff] %v2541_v10  ;;  %v2544_v28 = vsel %vm2480_vm11, %v2386_v34, %v2512_v27 }
 0x445   :  { %2576 = vst [vmem:[%s4749_s4 + $0x58] sm:$0xff] %v2544_v28  ;;  %v2542_v4 = vsel %vm2478_vm12, %v2378_v47, %v2510_v20 }
 0x446   :  { %2574 = vst [vmem:[%s4749_s4 + $0x48] sm:$0xff] %v2542_v4 }
 0x44d   :  { %v3307_v26 = vpop.f32.mrb[140].mxu1 }
 0x44e   :  { %v2399_v21 = vadd.f32 %v3307_v26, %v4615_v50  ;;  %v2390_v41 = vpop.f32.mrb[141].mxu1 }
 0x44f   :  { %v2391_v54 = vadd.f32 %v2390_v41, %v4615_v50  ;;  %v3308_v45 = vpop.f32.mrb[142].mxu1 }
 0x450   :  { %vm2483_vm13 = vcmp.gt.f32.partialorder %v2399_v21, 0.0  ;;  %v2515_v31 = vmul.f32 0.01, %v2399_v21  ;;  %v2402_v32 = vadd.f32 %v3308_v45, %v4615_v50  ;;  %v2393_v1 = vpop.f32.mrb[143].mxu1 }
 0x451   :  { %vm2481_vm14 = vcmp.gt.f32.partialorder %v2391_v54, 0.0  ;;  %v2513_v60 = vmul.f32 0.01, %v2391_v54  ;;  %v2394_v23 = vadd.f32 %v2393_v1, %v4615_v50 }
 0x452   :  { %v2547_v5 = vsel %vm2483_vm13, %v2399_v21, %v2515_v31  ;;  %vm2484_vm15 = vcmp.gt.f32.partialorder %v2402_v32, 0.0  ;;  %v2516_v24 = vmul.f32 0.01, %v2402_v32 }
 0x453   :  { %2579 = vst [vmem:[%s4749_s4 + $0x70] sm:$0xff] %v2547_v5  ;;  %v2545_v12 = vsel %vm2481_vm14, %v2391_v54, %v2513_v60  ;;  %vm2482_vm0 = vcmp.gt.f32.partialorder %v2394_v23, 0.0  ;;  %v2514_v6 = vmul.f32 0.01, %v2394_v23 }
 0x454   :  { %2577 = vst [vmem:[%s4749_s4 + $0x60] sm:$0xff] %v2545_v12  ;;  %v2548_v59 = vsel %vm2484_vm15, %v2402_v32, %v2516_v24 }
 0x455   :  { %2580 = vst [vmem:[%s4749_s4 + $0x78] sm:$0xff] %v2548_v59  ;;  %v2546_v38 = vsel %vm2482_vm0, %v2394_v23, %v2514_v6 }
 0x456   :  { %2578 = vst [vmem:[%s4749_s4 + $0x68] sm:$0xff] %v2546_v38 }
 0x45d   :  { %v3311_v2 = vpop.f32.mrb[144].mxu1 }
 0x45e   :  { %v2415_v46 = vadd.f32 %v3311_v2, %v4615_v50  ;;  %v2406_v52 = vpop.f32.mrb[145].mxu1 }
 0x45f   :  { %v2407_v0 = vadd.f32 %v2406_v52, %v4615_v50  ;;  %v3312_v42 = vpop.f32.mrb[146].mxu1 }
 0x460   :  { %vm2487_vm1 = vcmp.gt.f32.partialorder %v2415_v46, 0.0  ;;  %v2519_v33 = vmul.f32 0.01, %v2415_v46  ;;  %v2418_v36 = vadd.f32 %v3312_v42, %v4615_v50  ;;  %v2409_v39 = vpop.f32.mrb[147].mxu1 }
 0x461   :  { %vm2485_vm2 = vcmp.gt.f32.partialorder %v2407_v0, 0.0  ;;  %v2517_v11 = vmul.f32 0.01, %v2407_v0  ;;  %v2410_v37 = vadd.f32 %v2409_v39, %v4615_v50 }
 0x462   :  { %v2551_v44 = vsel %vm2487_vm1, %v2415_v46, %v2519_v33  ;;  %vm2488_vm3 = vcmp.gt.f32.partialorder %v2418_v36, 0.0  ;;  %v2520_v35 = vmul.f32 0.01, %v2418_v36 }
 0x463   :  { %2583 = vst [vmem:[%s4749_s4 + $0x90] sm:$0xff] %v2551_v44  ;;  %v2549_v57 = vsel %vm2485_vm2, %v2407_v0, %v2517_v11  ;;  %vm2486_vm4 = vcmp.gt.f32.partialorder %v2410_v37, 0.0  ;;  %v2518_v49 = vmul.f32 0.01, %v2410_v37 }
 0x464   :  { %2581 = vst [vmem:[%s4749_s4 + $0x80] sm:$0xff] %v2549_v57  ;;  %v2552_v53 = vsel %vm2488_vm3, %v2418_v36, %v2520_v35 }
 0x465   :  { %2584 = vst [vmem:[%s4749_s4 + $0x98] sm:$0xff] %v2552_v53  ;;  %v2550_v9 = vsel %vm2486_vm4, %v2410_v37, %v2518_v49 }
 0x466   :  { %2582 = vst [vmem:[%s4749_s4 + $0x88] sm:$0xff] %v2550_v9 }
 0x46d   :  { %v3315_v19 = vpop.f32.mrb[148].mxu1 }
 0x46e   :  { %v2431_v29 = vadd.f32 %v3315_v19, %v4615_v50  ;;  %v2422_v56 = vpop.f32.mrb[149].mxu1 }
 0x46f   :  { %v2423_v13 = vadd.f32 %v2422_v56, %v4615_v50  ;;  %v3316_v48 = vpop.f32.mrb[150].mxu1 }
 0x470   :  { %vm2491_vm5 = vcmp.gt.f32.partialorder %v2431_v29, 0.0  ;;  %v2523_v14 = vmul.f32 0.01, %v2431_v29  ;;  %v2434_v51 = vadd.f32 %v3316_v48, %v4615_v50  ;;  %v2425_v30 = vpop.f32.mrb[151].mxu1 }
 0x471   :  { %vm2489_vm6 = vcmp.gt.f32.partialorder %v2423_v13, 0.0  ;;  %v2521_v18 = vmul.f32 0.01, %v2423_v13  ;;  %v2426_v61 = vadd.f32 %v2425_v30, %v4615_v50 }
 0x472   :  { %v2555_v3 = vsel %vm2491_vm5, %v2431_v29, %v2523_v14  ;;  %vm2492_vm7 = vcmp.gt.f32.partialorder %v2434_v51, 0.0  ;;  %v2524_v22 = vmul.f32 0.01, %v2434_v51 }
 0x473   :  { %2587 = vst [vmem:[%s4749_s4 + $0xb0] sm:$0xff] %v2555_v3  ;;  %v2553_v62 = vsel %vm2489_vm6, %v2423_v13, %v2521_v18  ;;  %vm2490_vm8 = vcmp.gt.f32.partialorder %v2426_v61, 0.0  ;;  %v2522_v25 = vmul.f32 0.01, %v2426_v61 }
 0x474   :  { %2585 = vst [vmem:[%s4749_s4 + $0xa0] sm:$0xff] %v2553_v62  ;;  %v2556_v58 = vsel %vm2492_vm7, %v2434_v51, %v2524_v22 }
 0x475   :  { %2588 = vst [vmem:[%s4749_s4 + $0xb8] sm:$0xff] %v2556_v58  ;;  %v2554_v16 = vsel %vm2490_vm8, %v2426_v61, %v2522_v25 }
 0x476   :  { %2586 = vst [vmem:[%s4749_s4 + $0xa8] sm:$0xff] %v2554_v16 }
 0x47d   :  { %v3319_v63 = vpop.f32.mrb[152].mxu1 }
 0x47e   :  { %v2447_v8 = vadd.f32 %v3319_v63, %v4615_v50  ;;  %v2438_v40 = vpop.f32.mrb[153].mxu1 }
 0x47f   :  { %v2439_v17 = vadd.f32 %v2438_v40, %v4615_v50  ;;  %v3320_v15 = vpop.f32.mrb[154].mxu1 }
 0x480   :  { %vm2495_vm9 = vcmp.gt.f32.partialorder %v2447_v8, 0.0  ;;  %v2527_v34 = vmul.f32 0.01, %v2447_v8  ;;  %v2450_v55 = vadd.f32 %v3320_v15, %v4615_v50  ;;  %v2441_v43 = vpop.f32.mrb[155].mxu1 }
 0x481   :  { %vm2493_vm10 = vcmp.gt.f32.partialorder %v2439_v17, 0.0  ;;  %v2525_v47 = vmul.f32 0.01, %v2439_v17  ;;  %v2442_v7 = vadd.f32 %v2441_v43, %v4615_v50 }
 0x482   :  { %v2559_v27 = vsel %vm2495_vm9, %v2447_v8, %v2527_v34  ;;  %vm2496_vm11 = vcmp.gt.f32.partialorder %v2450_v55, 0.0  ;;  %v2528_v10 = vmul.f32 0.01, %v2450_v55 }
 0x483   :  { %2591 = vst [vmem:[%s4749_s4 + $0xd0] sm:$0xff] %v2559_v27  ;;  %v2557_v20 = vsel %vm2493_vm10, %v2439_v17, %v2525_v47  ;;  %vm2494_vm12 = vcmp.gt.f32.partialorder %v2442_v7, 0.0  ;;  %v2526_v28 = vmul.f32 0.01, %v2442_v7 }
 0x484   :  { %2589 = vst [vmem:[%s4749_s4 + $0xc0] sm:$0xff] %v2557_v20  ;;  %v2560_v4 = vsel %vm2496_vm11, %v2450_v55, %v2528_v10 }
 0x485   :  { %2592 = vst [vmem:[%s4749_s4 + $0xd8] sm:$0xff] %v2560_v4  ;;  %v2558_v26 = vsel %vm2494_vm12, %v2442_v7, %v2526_v28 }
 0x486   :  { %2590 = vst [vmem:[%s4749_s4 + $0xc8] sm:$0xff] %v2558_v26 }
 0x48d   :  { %v3323_v21 = vpop.f32.mrb[156].mxu1 }
 0x48e   :  { %v2463_v41 = vadd.f32 %v3323_v21, %v4615_v50  ;;  %v2454_v54 = vpop.f32.mrb[157].mxu1 }
 0x48f   :  { %v2455_v45 = vadd.f32 %v2454_v54, %v4615_v50  ;;  %v3324_v31 = vpop.f32.mrb[158].mxu1 }
 0x490   :  { %vm2499_vm13 = vcmp.gt.f32.partialorder %v2463_v41, 0.0  ;;  %v2531_v32 = vmul.f32 0.01, %v2463_v41  ;;  %v2466_v1 = vadd.f32 %v3324_v31, %v4615_v50  ;;  %v2457_v60 = vpop.f32.mrb[159].mxu1 }
 0x491   :  { %vm2497_vm14 = vcmp.gt.f32.partialorder %v2455_v45, 0.0  ;;  %v2529_v23 = vmul.f32 0.01, %v2455_v45  ;;  %v2458_v5 = vadd.f32 %v2457_v60, %v4615_v50 }
 0x492   :  { %v2563_v24 = vsel %vm2499_vm13, %v2463_v41, %v2531_v32  ;;  %vm2500_vm15 = vcmp.gt.f32.partialorder %v2466_v1, 0.0  ;;  %v2532_v12 = vmul.f32 0.01, %v2466_v1 }
 0x493   :  { %2595 = vst [vmem:[%s4749_s4 + $0xf0] sm:$0xff] %v2563_v24  ;;  %v2561_v6 = vsel %vm2497_vm14, %v2455_v45, %v2529_v23  ;;  %vm2498_vm0 = vcmp.gt.f32.partialorder %v2458_v5, 0.0  ;;  %v2530_v59 = vmul.f32 0.01, %v2458_v5 }
 0x494   :  { %2593 = vst [vmem:[%s4749_s4 + $0xe0] sm:$0xff] %v2561_v6  ;;  %v2564_v38 = vsel %vm2500_vm15, %v2466_v1, %v2532_v12 }
 0x495   :  { %2596 = vst [vmem:[%s4749_s4 + $0xf8] sm:$0xff] %v2564_v38  ;;  %v2562_v50 = vsel %vm2498_vm0, %v2458_v5, %v2530_v59 }
 0x496   :  { %2594 = vst [vmem:[%s4749_s4 + $0xe8] sm:$0xff] %v2562_v50 }

</bundles_post_ra>
